<compile_context>
chip_gen: v5e
topology: v5e:2x2
jax: 0.10.0
libtpu: 0.0.40
codegen_flags: <defaults>
</compile_context>

<pallas_src>
from functools import partial

import jax
import jax.numpy as jnp
from jax import lax
from jax.experimental import pallas as pl
from jax.experimental.pallas import tpu as pltpu

_ADAIN_EPS = 1e-5
# Explicit scoped-VMEM cap: safe on v5e/v6e (128 MiB phys) and v7x (64 MiB).
_VMEM_LIMIT_BYTES = 32 * 1024 * 1024


def _cparams():
    return pltpu.CompilerParams(dimension_semantics=("parallel",),
                                vmem_limit_bytes=_VMEM_LIMIT_BYTES)


# ----------------------------------------------------------------------------
# Wrapper-side layout helpers (tiny XLA reshapes, fused under jit)
# ----------------------------------------------------------------------------
def space_to_depth(x):
    """(B,C,H,W) -> (B,4C,H/2,W/2); channel = (row_par*2+col_par)*C + c."""
    b, c, h, w = x.shape
    x = x.reshape(b, c, h // 2, 2, w // 2, 2)
    x = x.transpose(0, 3, 5, 1, 2, 4)
    return x.reshape(b, 4 * c, h // 2, w // 2)


def flatpad(x):
    """(B,C,h,w) -> (B,C,(h+3)*(w+2)) zero-padded row-flattened conv-input slab.

    Row width is w+2 (1 col pad each side); 1 pad row on top, 2 below."""
    b, c, h, w = x.shape
    xp = jnp.pad(x, ((0, 0), (0, 0), (1, 2), (1, 1)))
    return xp.reshape(b, c, (h + 3) * (w + 2))


def unflatten_valid(x_flat, h, w):
    """(B,C,h*(w+2)) plain conv-output slab -> (B,C,h,w) (drop 2 junk cols)."""
    b, c, _ = x_flat.shape
    return x_flat.reshape(b, c, h, w + 2)[:, :, :, :w]


# ----------------------------------------------------------------------------
# Weight re-indexing (trace-time, tiny): fold stride-2 / 2x-upsample into taps
# ----------------------------------------------------------------------------
def _stride2_s2d_weights(w):
    """3x3/stride-2/pad-1 conv -> 2x2-tap conv on the space-to-depth input.

    w: (3,3,O,C).  Returns (taps, stacked (O, 4*4C)); a pure permutation of the
    original weights (exact), tap order matches the kernel's slice stacking."""
    o, c = w.shape[2], w.shape[3]

    def kmap(k):  # original tap index -> (source plane parity, padded offset)
        return (1, 0) if k == 0 else ((0, 1) if k == 1 else (1, 1))

    taps = [(0, 0), (0, 1), (1, 0), (1, 1)]
    blocks = {t: jnp.zeros((o, 4 * c), w.dtype) for t in taps}
    for ky in range(3):
        pr, dy = kmap(ky)
        for kx in range(3):
            pc, dx = kmap(kx)
            p = pr * 2 + pc
            blocks[(dy, dx)] = blocks[(dy, dx)].at[:, p * c:(p + 1) * c].add(w[ky, kx])
    return taps, jnp.concatenate([blocks[t] for t in taps], axis=1)


def _up2_conv_weights(w):
    """2x nearest-upsample + 3x3/pad-1 conv -> 3x3-tap conv on the *low-res*
    input with the output's 2x2 pixel parities folded into 4x output channels
    (space-to-depth output layout).  w: (3,3,O,C) -> (taps, (4O, 9C))."""
    o, c = w.shape[2], w.shape[3]
    taps = [(dy, dx) for dy in range(3) for dx in range(3)]
    blocks = {t: jnp.zeros((4 * o, c), w.dtype) for t in taps}
    for py in range(2):
        for px in range(2):
            ob = (py * 2 + px) * o
            for ky in range(3):
                dy = (py + ky - 1) // 2 + 1
                for kx in range(3):
                    dx = (px + kx - 1) // 2 + 1
                    blocks[(dy, dx)] = blocks[(dy, dx)].at[ob:ob + o, :].add(w[ky, kx])
    return taps, jnp.concatenate([blocks[t] for t in taps], axis=1)


def _up2_conv_s2d_in_weights(w):
    """Like _up2_conv_weights, but the low-res input is itself already stored
    in space-to-depth layout (4C channels): output parity becomes 4x4 = 16
    channel groups.  w: (3,3,O,C) -> (taps, (16O, 9*4C))."""
    o, c = w.shape[2], w.shape[3]
    taps = [(dy, dx) for dy in range(3) for dx in range(3)]
    blocks = {t: jnp.zeros((16 * o, 4 * c), w.dtype) for t in taps}

    def smap(s):                      # s = out_parity + k - 1  in [-1, 4]
        u = s // 2                    # low-res row offset from 2a
        pr = u % 2                    # parity of that row
        return (u - pr) // 2 + 1, pr  # (padded tap offset, source plane parity)

    for ry in range(4):
        for rx in range(4):
            ob = (ry * 4 + rx) * o
            for ky in range(3):
                dy, pr = smap(ry + ky - 1)
                for kx in range(3):
                    dx, pc = smap(rx + kx - 1)
                    ib = (pr * 2 + pc) * c
                    blocks[(dy, dx)] = blocks[(dy, dx)].at[ob:ob + o, ib:ib + c].add(w[ky, kx])
    return taps, jnp.concatenate([blocks[t] for t in taps], axis=1)


# ----------------------------------------------------------------------------
# Pallas kernels
# ----------------------------------------------------------------------------
def _conv_core(x_ref, w_ref, offs, mo):
    # Single K*Cin contraction: stack the K shifted tap slices along the
    # sublane (contraction) axis and run ONE MXU matmul (bf16 in, f32 acc).
    parts = [x_ref[0, :, o:o + mo] for o in offs]
    stacked = parts[0] if len(parts) == 1 else jnp.concatenate(parts, axis=0)
    return jnp.dot(w_ref[...], stacked, preferred_element_type=jnp.float32)


def _emit_flatpad(res, wrow, lpad_len):
    """Place a junk-masked conv result directly into the consumer's FlatPad
    layout (valid data starts at lane wrow+1; masked junk lanes land exactly on
    the consumer's zero pads)."""
    cout, mo = res.shape
    head = jnp.zeros((cout, wrow + 1), jnp.float32)
    tail = jnp.zeros((cout, lpad_len - (wrow + 1) - mo), jnp.float32)
    return jnp.concatenate([head, res, tail], axis=1)


def _conv_bias_kernel(x_ref, w_ref, b_ref, o_ref, *, offs, mo, relu):
    acc = _conv_core(x_ref, w_ref, offs, mo) + b_ref[...]
    if relu:
        acc = jnp.maximum(acc, 0.0)
    o_ref[0] = acc.astype(o_ref.dtype)


def _conv_relu_adain_kernel(x_ref, w_ref, b_ref, g_ref, be_ref, m_ref, o_ref, *,
                            offs, mo, wrow, n_valid, lpad_len):
    # conv + bias + ReLU + AdaIN(z) fused; one-pass masked mean / E[x^2].
    y = jnp.maximum(_conv_core(x_ref, w_ref, offs, mo) + b_ref[...], 0.0)
    mask = m_ref[...]                                   # (1, mo), junk lanes = 0
    ym = y * mask
    mean = jnp.sum(ym, axis=1, keepdims=True) / n_valid
    var = jnp.sum(ym * y, axis=1, keepdims=True) / n_valid - mean * mean
    out = ((y - mean) * lax.rsqrt(var + _ADAIN_EPS) * g_ref[0] + be_ref[0]) * mask
    o_ref[0] = _emit_flatpad(out, wrow, lpad_len).astype(o_ref.dtype)


def _conv_skipadain_kernel(x_ref, w_ref, b_ref, f_ref, g_ref, be_ref, m_ref, o_ref, *,
                           offs, mo, wrow, lpad_len, n_planes, c_skip, n_valid_skip):
    # conv + bias, then fused AdaIN(skip feature, grouped over its 4 parity
    # planes) + skip-add + ReLU.  The skip lives in its own FlatPad slab (the
    # same buffer the previous conv reads): the value aligned with output lane
    # l sits at lane l + wrow + 1, and all of its pad lanes are exactly zero.
    d = _conv_core(x_ref, w_ref, offs, mo) + b_ref[...]
    f = f_ref[0, :, wrow + 1:wrow + 1 + mo].astype(jnp.float32)
    fg = f.reshape(n_planes, c_skip, mo)
    fsum = jnp.sum(fg, axis=0)                           # (c_skip, mo)
    fsq = jnp.sum(fg * fg, axis=0)
    mean = jnp.sum(fsum, axis=1, keepdims=True) / n_valid_skip
    var = jnp.sum(fsq, axis=1, keepdims=True) / n_valid_skip - mean * mean
    normed = ((fg - mean[None]) * lax.rsqrt(var[None] + _ADAIN_EPS)
              * g_ref[0][None] + be_ref[0][None])
    out = jnp.maximum(normed.reshape(n_planes * c_skip, mo) + d, 0.0) * m_ref[...]
    o_ref[0] = _emit_flatpad(out, wrow, lpad_len).astype(o_ref.dtype)


def _recover_stats_kernel(p_ref, g_ref, s_ref, *, min_t, max_t):
    # One grid step per batch image: masked partial sums over the whole H*W.
    # TODO(synk): band the reduction over an inner "arbitrary" grid axis for
    # very large H*W instead of one full-row block.
    p = p_ref[0]
    g = g_ref[0]
    m = jnp.logical_and(g > min_t, g < max_t).astype(jnp.float32)
    mp = m * p
    s_pp = jnp.sum(mp * p, axis=-1, keepdims=True)
    s_p = jnp.sum(mp, axis=-1, keepdims=True)
    s_n = jnp.sum(m, axis=-1, keepdims=True)
    s_pg = jnp.sum(mp * g, axis=-1, keepdims=True)
    s_g = jnp.sum(m * g, axis=-1, keepdims=True)
    pad = jnp.zeros((1, 3), jnp.float32)
    s_ref[0] = jnp.concatenate([s_pp, s_p, s_n, s_pg, s_g, pad], axis=-1)


# ----------------------------------------------------------------------------
# pallas_call helper: one image per grid step (>=2 parallel programs for v7x).
# Weights are tiny (<=18 KiB) so per-step restaging is negligible; for large B
# multiple images per step could be folded into the lane axis.
# TODO(synk): at production resolutions, additionally tile output rows with
# halo'd input bands so double-buffered blocks stay within v7x's 64 MiB VMEM.
# ----------------------------------------------------------------------------
def _pcall(kernel, arrays, out_sds):
    b = out_sds.shape[0]
    in_specs = []
    for a in arrays:
        if a.ndim == 3:   # batch-major activation / per-batch modulation
            in_specs.append(pl.BlockSpec((1,) + a.shape[1:], lambda i: (i, 0, 0)))
        else:             # batch-independent weights / bias / mask
            in_specs.append(pl.BlockSpec(a.shape, lambda i: (0, 0)))
    return pl.pallas_call(
        kernel,
        out_shape=out_sds,
        grid=(b,),
        in_specs=in_specs,
        out_specs=pl.BlockSpec((1,) + out_sds.shape[1:], lambda i: (i, 0, 0)),
        compiler_params=_cparams(),
    )(*arrays)


# ----------------------------------------------------------------------------
# z -> AdaIN modulation (single merged XLA matmul)
# ----------------------------------------------------------------------------
def _zmap_split(params, z):
    zmap = z.astype(jnp.float32) @ params["wz"] + params["bz"]
    c2 = params["w2"].shape[2]
    c1 = params["w1"].shape[2]
    g2 = 1.0 + zmap[:, :c2]
    b2 = zmap[:, c2:2 * c2]
    g1 = 1.0 + zmap[:, 2 * c2:2 * c2 + c1]
    b1 = zmap[:, 2 * c2 + c1:2 * c2 + 2 * c1]
    return g2, b2, g1, b1


# ----------------------------------------------------------------------------
# DepthModel_cIMLE_v2 forward (synthetic encoder + cIMLE decoder)
# ----------------------------------------------------------------------------
def depth_model_forward(params, rgb, z):
    # TODO(synk): real encoder backbone (cfg.MODEL.ENCODER) and Decoder_cIMLE
    # internals are external; this is a structurally-analogous replacement.
    b, _, h, w = rgb.shape
    assert h % 4 == 0 and w % 4 == 0
    h1, w1 = h // 2, w // 2
    h2, w2 = h // 4, w // 4
    c1 = params["w1"].shape[2]       # 8
    c2 = params["w2"].shape[2]       # 16
    c3 = params["w3"].shape[2]       # 8
    c4 = params["w4"].shape[2]       # 1

    scale2, shift2, scale1, shift1 = _zmap_split(params, z)

    # --- encoder conv1: 3x3 / stride 2 / pad 1 + ReLU (native stride-2) ---
    wrow1 = w1 + 2
    mo1 = h1 * wrow1
    rgb4 = jnp.pad(rgb, ((0, 0), (0, 1), (0, 0), (0, 0)))        # 3 -> 4 channels
    x0 = flatpad(space_to_depth(rgb4)).astype(jnp.bfloat16)      # (B,16,(h1+3)*wrow1)
    w1p = jnp.pad(params["w1"], ((0, 0), (0, 0), (0, 0), (0, 1)))
    taps, wst = _stride2_s2d_weights(w1p)
    f1 = _pcall(
        partial(_conv_bias_kernel, offs=[dy * wrow1 + dx for dy, dx in taps],
                mo=mo1, relu=True),
        [x0, wst.astype(jnp.bfloat16),
         params["b1"].astype(jnp.float32).reshape(-1, 1)],
        jax.ShapeDtypeStruct((b, c1, mo1), jnp.bfloat16))

    # s2d(f1) in FlatPad layout: consumed by BOTH conv2 and conv3's fused
    # AdaIN + skip epilogue (single bf16 materialisation).
    f1_s2d_pad = flatpad(space_to_depth(unflatten_valid(f1, h1, w1)))

    wrow2 = w2 + 2
    mo2 = h2 * wrow2
    lpad2 = (h2 + 3) * wrow2
    mask2 = ((jnp.arange(mo2) % wrow2) < w2).astype(jnp.float32).reshape(1, mo2)

    # --- encoder conv2 (stride 2) + ReLU + AdaIN(z), FlatPad bf16 output ---
    taps, wst = _stride2_s2d_weights(params["w2"])
    f2a_pad = _pcall(
        partial(_conv_relu_adain_kernel, offs=[dy * wrow2 + dx for dy, dx in taps],
                mo=mo2, wrow=wrow2, n_valid=float(h2 * w2), lpad_len=lpad2),
        [f1_s2d_pad, wst.astype(jnp.bfloat16),
         params["b2"].astype(jnp.float32).reshape(-1, 1),
         scale2.reshape(b, c2, 1), shift2.reshape(b, c2, 1), mask2],
        jax.ShapeDtypeStruct((b, c2, lpad2), jnp.bfloat16))

    # --- decoder conv3: 2x-up + 3x3 folded into weights; fused AdaIN(f1)
    #     + skip-add + ReLU; output in space-to-depth FlatPad layout ---
    taps, wst = _up2_conv_weights(params["w3"])
    x_pad = _pcall(
        partial(_conv_skipadain_kernel, offs=[dy * wrow2 + dx for dy, dx in taps],
                mo=mo2, wrow=wrow2, lpad_len=lpad2,
                n_planes=4, c_skip=c1, n_valid_skip=float(h1 * w1)),
        [f2a_pad, wst.astype(jnp.bfloat16),
         jnp.tile(params["b3"].astype(jnp.float32), 4).reshape(-1, 1),
         f1_s2d_pad, scale1.reshape(b, c1, 1), shift1.reshape(b, c1, 1), mask2],
        jax.ShapeDtypeStruct((b, 4 * c3, lpad2), jnp.bfloat16))

    # --- decoder conv4: 2x-up + 3x3 with the s2d input folded in; f32 logit ---
    taps, wst = _up2_conv_s2d_in_weights(params["w4"])
    logit_q = _pcall(
        partial(_conv_bias_kernel, offs=[dy * wrow2 + dx for dy, dx in taps],
                mo=mo2, relu=False),
        [x_pad, wst.astype(jnp.bfloat16),
         jnp.tile(params["b4"].astype(jnp.float32), 16).reshape(-1, 1)],
        jax.ShapeDtypeStruct((b, 16 * c4, mo2), jnp.float32))

    # depth-to-space (block 4) back to NCHW full resolution (one tiny XLA pass)
    lq = logit_q.reshape(b, 4, 4, c4, h2, wrow2)[:, :, :, :, :, :w2]
    logit = lq.transpose(0, 3, 4, 1, 5, 2).reshape(b, c4, h, w)
    return logit


# ----------------------------------------------------------------------------
# Scale/shift-invariant depth recovery
# ----------------------------------------------------------------------------
def recover_scale_shift_depth(pred, gt, min_threshold=1e-8, max_threshold=1e8):
    b, c, h, w = pred.shape
    hw = c * h * w
    hw_pad = max(128, ((hw + 127) // 128) * 128)
    pf = jnp.pad(pred.reshape(b, 1, hw).astype(jnp.float32),
                 ((0, 0), (0, 0), (0, hw_pad - hw)))
    gf = jnp.pad(gt.reshape(b, 1, hw).astype(jnp.float32),
                 ((0, 0), (0, 0), (0, hw_pad - hw)),
                 constant_values=-1e30)                     # padded gt -> masked out
    stats = _pcall(
        partial(_recover_stats_kernel, min_t=min_threshold, max_t=max_threshold),
        [pf, gf],
        jax.ShapeDtypeStruct((b, 1, 8), jnp.float32))[:, 0, :]

    s_pp, s_p, s_n, s_pg, s_g = (stats[:, i] for i in range(5))
    eps = 1e-6                                              # torch: A + 1e-6*I
    det = (s_pp + eps) * (s_n + eps) - s_p * s_p
    scale = ((s_n + eps) * s_pg - s_p * s_g) / det
    shift = ((s_pp + eps) * s_g - s_p * s_pg) / det
    # pass 2 is pure elementwise; XLA runs it at HBM roofline.
    return pred * scale[:, None, None, None] + shift[:, None, None, None]


# ----------------------------------------------------------------------------
# ModelLoss.decoder_loss path (LOSS_MODE = '_pairwise-normal-regress-edge_')
# ----------------------------------------------------------------------------
def decoder_loss(pred_depth, data):
    gt_depth = data["depth"]
    b = gt_depth.shape[0]
    total_loss = jnp.zeros((b,), jnp.float32)
    loss = {}
    # Note: the reference passes min_threshold = -1e-8 (negative) here — kept.
    pred_ssinv = recover_scale_shift_depth(pred_depth, gt_depth,
                                           min_threshold=-1e-8, max_threshold=10.1)
    # TODO(synk): EdgeguidedNormalRegressionLoss (pn_edge) is an external,
    # unspecified module; only the "no high-quality samples" branch is exact
    # (curr_loss = pred_ssinv.sum() * 0), which is what is computed (jit-safe).
    curr_loss = jnp.sum(pred_ssinv) * 0.0
    loss["pairwise-normal-regress-edge_loss"] = jnp.sum(curr_loss)
    total_loss = total_loss + curr_loss
    loss["total_loss"] = sum(loss.values())
    return loss, total_loss


def criterion(pred_logit, auxi, data):
    loss1, total_raw = decoder_loss(pred_logit, data)
    loss = dict(loss1)
    loss["total_loss"] = loss1["total_loss"]
    return loss, total_raw


def rel_depth_model_cimle_decoder_forward(params, data, z, is_train=True):
    logit = depth_model_forward(params, data["rgb"], z)
    auxi = None
    if is_train:
        losses_dict = criterion(logit, auxi, data)
    else:
        losses_dict = {"total_loss": jnp.float32(0.0)}
    return {"decoder": logit, "auxi": auxi, "losses": losses_dict}


# ----------------------------------------------------------------------------
# Plain-JAX references (correctness checks only)
# ----------------------------------------------------------------------------
def _reference_forward(params, rgb, z):
    def conv(x, wk, bias, stride):
        y = lax.conv_general_dilated(
            x.astype(jnp.bfloat16),
            jnp.transpose(wk, (2, 3, 0, 1)).astype(jnp.bfloat16),
            (stride, stride), ((1, 1), (1, 1)),
            dimension_numbers=("NCHW", "OIHW", "NCHW"),
            preferred_element_type=jnp.float32)
        return y + bias.reshape(1, -1, 1, 1)

    def adain(x, g, s):
        x = x.astype(jnp.float32)
        mean = jnp.mean(x, axis=(2, 3), keepdims=True)
        var = jnp.mean(x * x, axis=(2, 3), keepdims=True) - mean * mean
        return ((x - mean) * lax.rsqrt(var + _ADAIN_EPS)
                * g[:, :, None, None] + s[:, :, None, None])

    def up2(x):
        return jnp.repeat(jnp.repeat(x, 2, axis=2), 2, axis=3)

    g2, b2m, g1, b1m = _zmap_split(params, z)
    f1 = jnp.maximum(conv(rgb, params["w1"], params["b1"], 2), 0.0).astype(jnp.bfloat16)
    f2 = jnp.maximum(conv(f1, params["w2"], params["b2"], 2), 0.0)
    f2a = adain(f2, g2, b2m).astype(jnp.bfloat16)
    d1 = conv(up2(f2a), params["w3"], params["b3"], 1)
    x = jnp.maximum(adain(f1, g1, b1m) + d1, 0.0).astype(jnp.bfloat16)
    return conv(up2(x), params["w4"], params["b4"], 1)


def _reference_recover(pred, gt, min_t, max_t):
    b = pred.shape[0]
    p = pred.reshape(b, -1).astype(jnp.float32)
    g = gt.reshape(b, -1).astype(jnp.float32)
    m = ((g > min_t) & (g < max_t)).astype(jnp.float32)
    spp, sp, sn = jnp.sum(m * p * p, 1), jnp.sum(m * p, 1), jnp.sum(m, 1)
    spg, sg = jnp.sum(m * p * g, 1), jnp.sum(m * g, 1)
    eps = 1e-6
    det = (spp + eps) * (sn + eps) - sp * sp
    scale = ((sn + eps) * spg - sp * sg) / det
    shift = ((spp + eps) * sg - sp * spg) / det
    return pred * scale[:, None, None, None] + shift[:, None, None, None]


# ----------------------------------------------------------------------------
# Deterministic synthetic parameters + demo run
# ----------------------------------------------------------------------------
def init_params(key, d_latent):
    ks = jax.random.split(key, 10)

    def w(k, shape, s=0.1):
        return jax.random.normal(k, shape, jnp.float32) * s

    # conv weights stored as (kh, kw, out_ch, in_ch)
    return {
        "w1": w(ks[0], (3, 3, 8, 3)),  "b1": w(ks[1], (8,), 0.05),
        "w2": w(ks[2], (3, 3, 16, 8)), "b2": w(ks[3], (16,), 0.05),
        "w3": w(ks[4], (3, 3, 8, 16)), "b3": w(ks[5], (8,), 0.05),
        "w4": w(ks[6], (3, 3, 1, 8)),  "b4": w(ks[7], (1,), 0.05),
        "wz": w(ks[8], (d_latent, 48)), "bz": w(ks[9], (48,), 0.05),
    }


if __name__ == "__main__":
    B, H, W = 2, 16, 16
    d_latent = 32

    key = jax.random.PRNGKey(0)
    k_par, k_rgb, k_z, k_gt = jax.random.split(key, 4)

    params = init_params(k_par, d_latent)
    rgb = jax.random.normal(k_rgb, (B, 3, H, W), jnp.float32)
    z = jax.random.normal(k_z, (B, d_latent), jnp.float32)
    # gt depth spans (0.1, 12) so some pixels fall outside the (-1e-8, 10.1) mask
    depth_gt = jax.random.uniform(k_gt, (B, 1, H, W), jnp.float32, 0.1, 12.0)
    data = {
        "rgb": rgb,
        "depth": depth_gt,
        "quality_flg": jnp.array([1, 2], jnp.int32),   # no high-quality samples
        "focal_length": jnp.ones((B,), jnp.float32),
    }

    fwd = jax.jit(lambda p, d, zz: rel_depth_model_cimle_decoder_forward(
        p, d, zz, is_train=True))
    out = fwd(params, data, z)
    jax.block_until_ready(out["decoder"])
    losses, total_raw = out["losses"]
    jax.block_until_ready(losses["total_loss"])

    # --- correctness: Pallas forward vs plain-JAX lax.conv reference ---
    ref_logit = jax.jit(_reference_forward)(params, rgb, z)
    max_diff = float(jnp.max(jnp.abs(out["decoder"] - ref_logit)))
    assert out["decoder"].shape == (B, 1, H, W)
    assert bool(jnp.all(jnp.isfinite(out["decoder"])))
    assert max_diff < 0.1, f"forward mismatch vs reference: {max_diff}"

    # --- correctness: Pallas recover_scale_shift vs plain-JAX reference ---
    ssinv = jax.jit(lambda p, g: recover_scale_shift_depth(p, g, -1e-8, 10.1))(
        out["decoder"], depth_gt)
    ssinv_ref = _reference_recover(out["decoder"], depth_gt, -1e-8, 10.1)
    rec_diff = float(jnp.max(jnp.abs(ssinv - ssinv_ref)))
    assert rec_diff < 1e-2, f"recover mismatch vs reference: {rec_diff}"
    assert bool(jnp.isfinite(losses["total_loss"]))

    print("KERNEL_OK")
</pallas_src>

<mosaic_0001>
module attributes {stable_mosaic.version = 11 : i64} {
  func.func @_conv_bias_kernel(%arg0: i32, %arg1: memref<1x16x110xbf16, #tpu.memory_space<vmem>>, %arg2: memref<8x64xbf16, #tpu.memory_space<vmem>>, %arg3: memref<8x1xf32, #tpu.memory_space<vmem>>, %arg4: memref<1x8x80xbf16, #tpu.memory_space<vmem>>) attributes {dimension_semantics = [#tpu.dimension_semantics<parallel>], iteration_bounds = array<i64: 2>, scalar_prefetch = 0 : i64, scratch_operands = 0 : i64, tpu.core_type = #tpu.core_type<tc>, window_params = [{transform_indices = @transform_0, window_bounds = array<i64: 1, 16, 110>}, {pipeline_mode = #tpu.pipeline_mode<synchronous>, transform_indices = @transform_1, window_bounds = array<i64: 8, 64>}, {pipeline_mode = #tpu.pipeline_mode<synchronous>, transform_indices = @transform_2, window_bounds = array<i64: 8, 1>}, {transform_indices = @transform_3, window_bounds = array<i64: 1, 8, 80>}]} {
    %c0 = arith.constant 0 : index
    %c0_0 = arith.constant 0 : index
    %c0_1 = arith.constant 0 : index
    %0 = vector.load %arg1[%c0, %c0_0, %c0_1] : memref<1x16x110xbf16, #tpu.memory_space<vmem>>, vector<1x16x80xbf16>
    %1 = vector.shape_cast %0 : vector<1x16x80xbf16> to vector<16x80xbf16>
    %c0_2 = arith.constant 0 : index
    %c0_3 = arith.constant 0 : index
    %c1 = arith.constant 1 : index
    %2 = vector.load %arg1[%c0_2, %c0_3, %c1] : memref<1x16x110xbf16, #tpu.memory_space<vmem>>, vector<1x16x80xbf16>
    %3 = vector.shape_cast %2 : vector<1x16x80xbf16> to vector<16x80xbf16>
    %c0_4 = arith.constant 0 : index
    %c0_5 = arith.constant 0 : index
    %c10 = arith.constant 10 : index
    %4 = vector.load %arg1[%c0_4, %c0_5, %c10] : memref<1x16x110xbf16, #tpu.memory_space<vmem>>, vector<1x16x80xbf16>
    %5 = vector.shape_cast %4 : vector<1x16x80xbf16> to vector<16x80xbf16>
    %c0_6 = arith.constant 0 : index
    %c0_7 = arith.constant 0 : index
    %c11 = arith.constant 11 : index
    %6 = vector.load %arg1[%c0_6, %c0_7, %c11] : memref<1x16x110xbf16, #tpu.memory_space<vmem>>, vector<1x16x80xbf16>
    %7 = vector.shape_cast %6 : vector<1x16x80xbf16> to vector<16x80xbf16>
    %8 = tpu.concatenate %1, %3, %5, %7 in 0 : vector<16x80xbf16>, vector<16x80xbf16>, vector<16x80xbf16>, vector<16x80xbf16> -> vector<64x80xbf16>
    %c0_8 = arith.constant 0 : index
    %c0_9 = arith.constant 0 : index
    %9 = vector.load %arg2[%c0_8, %c0_9] : memref<8x64xbf16, #tpu.memory_space<vmem>>, vector<8x64xbf16>
    %cst = arith.constant dense<0.000000e+00> : vector<8x80xf32>
    %10 = tpu.matmul %9, %8, %cst {dimension_numbers = #tpu.dot_dimension_numbers<[1], [0], [0], [1], [0, 0, 1, 1], [], []>} : vector<8x64xbf16>, vector<64x80xbf16>, vector<8x80xf32> -> vector<8x80xf32>
    %c0_10 = arith.constant 0 : index
    %c0_11 = arith.constant 0 : index
    %11 = vector.load %arg3[%c0_10, %c0_11] : memref<8x1xf32, #tpu.memory_space<vmem>>, vector<8x1xf32>
    %12 = vector.broadcast %11 : vector<8x1xf32> to vector<8x80xf32>
    %13 = arith.addf %10, %12 : vector<8x80xf32>
    %cst_12 = arith.constant 0.000000e+00 : f32
    %14 = vector.broadcast %cst_12 : f32 to vector<8x80xf32>
    %15 = arith.maximumf %13, %14 : vector<8x80xf32>
    %16 = arith.truncf %15 : vector<8x80xf32> to vector<8x80xbf16>
    %c0_13 = arith.constant 0 : index
    %c0_14 = arith.constant 0 : index
    %c0_15 = arith.constant 0 : index
    %17 = vector.load %arg4[%c0_13, %c0_14, %c0_15] : memref<1x8x80xbf16, #tpu.memory_space<vmem>>, vector<1x8x80xbf16>
    %18 = vector.shape_cast %17 : vector<1x8x80xbf16> to vector<8x80xbf16>
    %19 = vector.shape_cast %16 : vector<8x80xbf16> to vector<1x8x80xbf16>
    tpu.vector_store %arg4[%c0_13, %c0_14, %c0_15], %19 {strides = array<i32>} : memref<1x8x80xbf16, #tpu.memory_space<vmem>>, vector<1x8x80xbf16>,
    return
  }
  func.func @transform_0(%arg0: i32) -> (i32, i32, i32) {
    %c0_i32 = arith.constant 0 : i32
    %c0_i32_0 = arith.constant 0 : i32
    %c0_i32_1 = arith.constant 0 : i32
    return %arg0, %c0_i32, %c0_i32_0 : i32, i32, i32
  }
  func.func @transform_1(%arg0: i32) -> (i32, i32) {
    %c0_i32 = arith.constant 0 : i32
    %c0_i32_0 = arith.constant 0 : i32
    %c0_i32_1 = arith.constant 0 : i32
    return %c0_i32, %c0_i32_0 : i32, i32
  }
  func.func @transform_2(%arg0: i32) -> (i32, i32) {
    %c0_i32 = arith.constant 0 : i32
    %c0_i32_0 = arith.constant 0 : i32
    %c0_i32_1 = arith.constant 0 : i32
    return %c0_i32, %c0_i32_0 : i32, i32
  }
  func.func @transform_3(%arg0: i32) -> (i32, i32, i32) {
    %c0_i32 = arith.constant 0 : i32
    %c0_i32_0 = arith.constant 0 : i32
    %c0_i32_1 = arith.constant 0 : i32
    return %arg0, %c0_i32, %c0_i32_0 : i32, i32, i32
  }
}

module attributes {stable_mosaic.version = 11 : i64} {
  func.func @_conv_relu_adain_kernel(%arg0: i32, %arg1: memref<1x32x42xbf16, #tpu.memory_space<vmem>>, %arg2: memref<16x128xbf16, #tpu.memory_space<vmem>>, %arg3: memref<16x1xf32, #tpu.memory_space<vmem>>, %arg4: memref<1x16x1xf32, #tpu.memory_space<vmem>>, %arg5: memref<1x16x1xf32, #tpu.memory_space<vmem>>, %arg6: memref<1x24xf32, #tpu.memory_space<vmem>>, %arg7: memref<1x16x42xbf16, #tpu.memory_space<vmem>>) attributes {dimension_semantics = [#tpu.dimension_semantics<parallel>], iteration_bounds = array<i64: 2>, scalar_prefetch = 0 : i64, scratch_operands = 0 : i64, tpu.core_type = #tpu.core_type<tc>, window_params = [{transform_indices = @transform_0, window_bounds = array<i64: 1, 32, 42>}, {pipeline_mode = #tpu.pipeline_mode<synchronous>, transform_indices = @transform_1, window_bounds = array<i64: 16, 128>}, {pipeline_mode = #tpu.pipeline_mode<synchronous>, transform_indices = @transform_2, window_bounds = array<i64: 16, 1>}, {transform_indices = @transform_3, window_bounds = array<i64: 1, 16, 1>}, {transform_indices = @transform_4, window_bounds = array<i64: 1, 16, 1>}, {pipeline_mode = #tpu.pipeline_mode<synchronous>, transform_indices = @transform_5, window_bounds = array<i64: 1, 24>}, {transform_indices = @transform_6, window_bounds = array<i64: 1, 16, 42>}]} {
    %c0 = arith.constant 0 : index
    %c0_0 = arith.constant 0 : index
    %c0_1 = arith.constant 0 : index
    %0 = vector.load %arg1[%c0, %c0_0, %c0_1] : memref<1x32x42xbf16, #tpu.memory_space<vmem>>, vector<1x32x24xbf16>
    %1 = vector.shape_cast %0 : vector<1x32x24xbf16> to vector<32x24xbf16>
    %c0_2 = arith.constant 0 : index
    %c0_3 = arith.constant 0 : index
    %c1 = arith.constant 1 : index
    %2 = vector.load %arg1[%c0_2, %c0_3, %c1] : memref<1x32x42xbf16, #tpu.memory_space<vmem>>, vector<1x32x24xbf16>
    %3 = vector.shape_cast %2 : vector<1x32x24xbf16> to vector<32x24xbf16>
    %c0_4 = arith.constant 0 : index
    %c0_5 = arith.constant 0 : index
    %c6 = arith.constant 6 : index
    %4 = vector.load %arg1[%c0_4, %c0_5, %c6] : memref<1x32x42xbf16, #tpu.memory_space<vmem>>, vector<1x32x24xbf16>
    %5 = vector.shape_cast %4 : vector<1x32x24xbf16> to vector<32x24xbf16>
    %c0_6 = arith.constant 0 : index
    %c0_7 = arith.constant 0 : index
    %c7 = arith.constant 7 : index
    %6 = vector.load %arg1[%c0_6, %c0_7, %c7] : memref<1x32x42xbf16, #tpu.memory_space<vmem>>, vector<1x32x24xbf16>
    %7 = vector.shape_cast %6 : vector<1x32x24xbf16> to vector<32x24xbf16>
    %8 = tpu.concatenate %1, %3, %5, %7 in 0 : vector<32x24xbf16>, vector<32x24xbf16>, vector<32x24xbf16>, vector<32x24xbf16> -> vector<128x24xbf16>
    %c0_8 = arith.constant 0 : index
    %c0_9 = arith.constant 0 : index
    %9 = vector.load %arg2[%c0_8, %c0_9] : memref<16x128xbf16, #tpu.memory_space<vmem>>, vector<16x128xbf16>
    %cst = arith.constant dense<0.000000e+00> : vector<16x24xf32>
    %10 = tpu.matmul %9, %8, %cst {dimension_numbers = #tpu.dot_dimension_numbers<[1], [0], [0], [1], [0, 0, 1, 1], [], []>} : vector<16x128xbf16>, vector<128x24xbf16>, vector<16x24xf32> -> vector<16x24xf32>
    %c0_10 = arith.constant 0 : index
    %c0_11 = arith.constant 0 : index
    %11 = vector.load %arg3[%c0_10, %c0_11] : memref<16x1xf32, #tpu.memory_space<vmem>>, vector<16x1xf32>
    %12 = vector.broadcast %11 : vector<16x1xf32> to vector<16x24xf32>
    %13 = arith.addf %10, %12 : vector<16x24xf32>
    %cst_12 = arith.constant 0.000000e+00 : f32
    %14 = vector.broadcast %cst_12 : f32 to vector<16x24xf32>
    %15 = arith.maximumf %13, %14 : vector<16x24xf32>
    %c0_13 = arith.constant 0 : index
    %c0_14 = arith.constant 0 : index
    %16 = vector.load %arg6[%c0_13, %c0_14] : memref<1x24xf32, #tpu.memory_space<vmem>>, vector<1x24xf32>
    %17 = vector.broadcast %16 : vector<1x24xf32> to vector<16x24xf32>
    %18 = arith.mulf %15, %17 : vector<16x24xf32>
    %cst_15 = arith.constant dense<0.000000e+00> : vector<16xf32>
    %19 = vector.multi_reduction <add>, %18, %cst_15 [1] : vector<16x24xf32> to vector<16xf32>
    %20 = vector.shape_cast %19 : vector<16xf32> to vector<16x1xf32>
    %cst_16 = arith.constant 1.600000e+01 : f32
    %21 = vector.broadcast %cst_16 : f32 to vector<16x1xf32>
    %22 = arith.divf %20, %21 : vector<16x1xf32>
    %23 = arith.mulf %18, %15 : vector<16x24xf32>
    %cst_17 = arith.constant dense<0.000000e+00> : vector<16xf32>
    %24 = vector.multi_reduction <add>, %23, %cst_17 [1] : vector<16x24xf32> to vector<16xf32>
    %25 = vector.shape_cast %24 : vector<16xf32> to vector<16x1xf32>
    %cst_18 = arith.constant 1.600000e+01 : f32
    %26 = vector.broadcast %cst_18 : f32 to vector<16x1xf32>
    %27 = arith.divf %25, %26 : vector<16x1xf32>
    %28 = arith.mulf %22, %22 : vector<16x1xf32>
    %29 = arith.subf %27, %28 : vector<16x1xf32>
    %30 = vector.broadcast %22 : vector<16x1xf32> to vector<16x24xf32>
    %31 = arith.subf %15, %30 : vector<16x24xf32>
    %cst_19 = arith.constant 9.99999974E-6 : f32
    %32 = vector.broadcast %cst_19 : f32 to vector<16x1xf32>
    %33 = arith.addf %29, %32 : vector<16x1xf32>
    %34 = math.rsqrt %33 : vector<16x1xf32>
    %35 = vector.broadcast %34 : vector<16x1xf32> to vector<16x24xf32>
    %36 = arith.mulf %31, %35 : vector<16x24xf32>
    %c0_20 = arith.constant 0 : index
    %c0_21 = arith.constant 0 : index
    %c0_22 = arith.constant 0 : index
    %37 = vector.load %arg4[%c0_20, %c0_21, %c0_22] : memref<1x16x1xf32, #tpu.memory_space<vmem>>, vector<1x16x1xf32>
    %38 = vector.shape_cast %37 : vector<1x16x1xf32> to vector<16x1xf32>
    %39 = vector.broadcast %38 : vector<16x1xf32> to vector<16x24xf32>
    %40 = arith.mulf %36, %39 : vector<16x24xf32>
    %c0_23 = arith.constant 0 : index
    %c0_24 = arith.constant 0 : index
    %c0_25 = arith.constant 0 : index
    %41 = vector.load %arg5[%c0_23, %c0_24, %c0_25] : memref<1x16x1xf32, #tpu.memory_space<vmem>>, vector<1x16x1xf32>
    %42 = vector.shape_cast %41 : vector<1x16x1xf32> to vector<16x1xf32>
    %43 = vector.broadcast %42 : vector<16x1xf32> to vector<16x24xf32>
    %44 = arith.addf %40, %43 : vector<16x24xf32>
    %45 = vector.broadcast %16 : vector<1x24xf32> to vector<16x24xf32>
    %46 = arith.mulf %44, %45 : vector<16x24xf32>
    %cst_26 = arith.constant 0.000000e+00 : f32
    %47 = vector.broadcast %cst_26 : f32 to vector<16x7xf32>
    %cst_27 = arith.constant 0.000000e+00 : f32
    %48 = vector.broadcast %cst_27 : f32 to vector<16x11xf32>
    %49 = tpu.concatenate %47, %46, %48 in 1 : vector<16x7xf32>, vector<16x24xf32>, vector<16x11xf32> -> vector<16x42xf32>
    %50 = arith.truncf %49 : vector<16x42xf32> to vector<16x42xbf16>
    %c0_28 = arith.constant 0 : index
    %c0_29 = arith.constant 0 : index
    %c0_30 = arith.constant 0 : index
    %51 = vector.load %arg7[%c0_28, %c0_29, %c0_30] : memref<1x16x42xbf16, #tpu.memory_space<vmem>>, vector<1x16x42xbf16>
    %52 = vector.shape_cast %51 : vector<1x16x42xbf16> to vector<16x42xbf16>
    %53 = vector.shape_cast %50 : vector<16x42xbf16> to vector<1x16x42xbf16>
    tpu.vector_store %arg7[%c0_28, %c0_29, %c0_30], %53 {strides = array<i32>} : memref<1x16x42xbf16, #tpu.memory_space<vmem>>, vector<1x16x42xbf16>,
    return
  }
  func.func @transform_0(%arg0: i32) -> (i32, i32, i32) {
    %c0_i32 = arith.constant 0 : i32
    %c0_i32_0 = arith.constant 0 : i32
    %c0_i32_1 = arith.constant 0 : i32
    return %arg0, %c0_i32, %c0_i32_0 : i32, i32, i32
  }
  func.func @transform_1(%arg0: i32) -> (i32, i32) {
    %c0_i32 = arith.constant 0 : i32
    %c0_i32_0 = arith.constant 0 : i32
    %c0_i32_1 = arith.constant 0 : i32
    return %c0_i32, %c0_i32_0 : i32, i32
  }
  func.func @transform_2(%arg0: i32) -> (i32, i32) {
    %c0_i32 = arith.constant 0 : i32
    %c0_i32_0 = arith.constant 0 : i32
    %c0_i32_1 = arith.constant 0 : i32
    return %c0_i32, %c0_i32_0 : i32, i32
  }
  func.func @transform_3(%arg0: i32) -> (i32, i32, i32) {
    %c0_i32 = arith.constant 0 : i32
    %c0_i32_0 = arith.constant 0 : i32
    %c0_i32_1 = arith.constant 0 : i32
    return %arg0, %c0_i32, %c0_i32_0 : i32, i32, i32
  }
  func.func @transform_4(%arg0: i32) -> (i32, i32, i32) {
    %c0_i32 = arith.constant 0 : i32
    %c0_i32_0 = arith.constant 0 : i32
    %c0_i32_1 = arith.constant 0 : i32
    return %arg0, %c0_i32, %c0_i32_0 : i32, i32, i32
  }
  func.func @transform_5(%arg0: i32) -> (i32, i32) {
    %c0_i32 = arith.constant 0 : i32
    %c0_i32_0 = arith.constant 0 : i32
    %c0_i32_1 = arith.constant 0 : i32
    return %c0_i32, %c0_i32_0 : i32, i32
  }
  func.func @transform_6(%arg0: i32) -> (i32, i32, i32) {
    %c0_i32 = arith.constant 0 : i32
    %c0_i32_0 = arith.constant 0 : i32
    %c0_i32_1 = arith.constant 0 : i32
    return %arg0, %c0_i32, %c0_i32_0 : i32, i32, i32
  }
}

module attributes {stable_mosaic.version = 11 : i64} {
  func.func @_conv_skipadain_kernel(%arg0: i32, %arg1: memref<1x16x42xbf16, #tpu.memory_space<vmem>>, %arg2: memref<32x144xbf16, #tpu.memory_space<vmem>>, %arg3: memref<32x1xf32, #tpu.memory_space<vmem>>, %arg4: memref<1x32x42xbf16, #tpu.memory_space<vmem>>, %arg5: memref<1x8x1xf32, #tpu.memory_space<vmem>>, %arg6: memref<1x8x1xf32, #tpu.memory_space<vmem>>, %arg7: memref<1x24xf32, #tpu.memory_space<vmem>>, %arg8: memref<1x32x42xbf16, #tpu.memory_space<vmem>>) attributes {dimension_semantics = [#tpu.dimension_semantics<parallel>], iteration_bounds = array<i64: 2>, scalar_prefetch = 0 : i64, scratch_operands = 0 : i64, tpu.core_type = #tpu.core_type<tc>, window_params = [{transform_indices = @transform_0, window_bounds = array<i64: 1, 16, 42>}, {pipeline_mode = #tpu.pipeline_mode<synchronous>, transform_indices = @transform_1, window_bounds = array<i64: 32, 144>}, {pipeline_mode = #tpu.pipeline_mode<synchronous>, transform_indices = @transform_2, window_bounds = array<i64: 32, 1>}, {transform_indices = @transform_3, window_bounds = array<i64: 1, 32, 42>}, {transform_indices = @transform_4, window_bounds = array<i64: 1, 8, 1>}, {transform_indices = @transform_5, window_bounds = array<i64: 1, 8, 1>}, {pipeline_mode = #tpu.pipeline_mode<synchronous>, transform_indices = @transform_6, window_bounds = array<i64: 1, 24>}, {transform_indices = @transform_7, window_bounds = array<i64: 1, 32, 42>}]} {
    %c0 = arith.constant 0 : index
    %c0_0 = arith.constant 0 : index
    %c0_1 = arith.constant 0 : index
    %0 = vector.load %arg1[%c0, %c0_0, %c0_1] : memref<1x16x42xbf16, #tpu.memory_space<vmem>>, vector<1x16x24xbf16>
    %1 = vector.shape_cast %0 : vector<1x16x24xbf16> to vector<16x24xbf16>
    %c0_2 = arith.constant 0 : index
    %c0_3 = arith.constant 0 : index
    %c1 = arith.constant 1 : index
    %2 = vector.load %arg1[%c0_2, %c0_3, %c1] : memref<1x16x42xbf16, #tpu.memory_space<vmem>>, vector<1x16x24xbf16>
    %3 = vector.shape_cast %2 : vector<1x16x24xbf16> to vector<16x24xbf16>
    %c0_4 = arith.constant 0 : index
    %c0_5 = arith.constant 0 : index
    %c2 = arith.constant 2 : index
    %4 = vector.load %arg1[%c0_4, %c0_5, %c2] : memref<1x16x42xbf16, #tpu.memory_space<vmem>>, vector<1x16x24xbf16>
    %5 = vector.shape_cast %4 : vector<1x16x24xbf16> to vector<16x24xbf16>
    %c0_6 = arith.constant 0 : index
    %c0_7 = arith.constant 0 : index
    %c6 = arith.constant 6 : index
    %6 = vector.load %arg1[%c0_6, %c0_7, %c6] : memref<1x16x42xbf16, #tpu.memory_space<vmem>>, vector<1x16x24xbf16>
    %7 = vector.shape_cast %6 : vector<1x16x24xbf16> to vector<16x24xbf16>
    %c0_8 = arith.constant 0 : index
    %c0_9 = arith.constant 0 : index
    %c7 = arith.constant 7 : index
    %8 = vector.load %arg1[%c0_8, %c0_9, %c7] : memref<1x16x42xbf16, #tpu.memory_space<vmem>>, vector<1x16x24xbf16>
    %9 = vector.shape_cast %8 : vector<1x16x24xbf16> to vector<16x24xbf16>
    %c0_10 = arith.constant 0 : index
    %c0_11 = arith.constant 0 : index
    %c8 = arith.constant 8 : index
    %10 = vector.load %arg1[%c0_10, %c0_11, %c8] : memref<1x16x42xbf16, #tpu.memory_space<vmem>>, vector<1x16x24xbf16>
    %11 = vector.shape_cast %10 : vector<1x16x24xbf16> to vector<16x24xbf16>
    %c0_12 = arith.constant 0 : index
    %c0_13 = arith.constant 0 : index
    %c12 = arith.constant 12 : index
    %12 = vector.load %arg1[%c0_12, %c0_13, %c12] : memref<1x16x42xbf16, #tpu.memory_space<vmem>>, vector<1x16x24xbf16>
    %13 = vector.shape_cast %12 : vector<1x16x24xbf16> to vector<16x24xbf16>
    %c0_14 = arith.constant 0 : index
    %c0_15 = arith.constant 0 : index
    %c13 = arith.constant 13 : index
    %14 = vector.load %arg1[%c0_14, %c0_15, %c13] : memref<1x16x42xbf16, #tpu.memory_space<vmem>>, vector<1x16x24xbf16>
    %15 = vector.shape_cast %14 : vector<1x16x24xbf16> to vector<16x24xbf16>
    %c0_16 = arith.constant 0 : index
    %c0_17 = arith.constant 0 : index
    %c14 = arith.constant 14 : index
    %16 = vector.load %arg1[%c0_16, %c0_17, %c14] : memref<1x16x42xbf16, #tpu.memory_space<vmem>>, vector<1x16x24xbf16>
    %17 = vector.shape_cast %16 : vector<1x16x24xbf16> to vector<16x24xbf16>
    %18 = tpu.concatenate %1, %3, %5, %7, %9, %11, %13, %15, %17 in 0 : vector<16x24xbf16>, vector<16x24xbf16>, vector<16x24xbf16>, vector<16x24xbf16>, vector<16x24xbf16>, vector<16x24xbf16>, vector<16x24xbf16>, vector<16x24xbf16>, vector<16x24xbf16> -> vector<144x24xbf16>
    %c0_18 = arith.constant 0 : index
    %c0_19 = arith.constant 0 : index
    %19 = vector.load %arg2[%c0_18, %c0_19] : memref<32x144xbf16, #tpu.memory_space<vmem>>, vector<32x144xbf16>
    %cst = arith.constant dense<0.000000e+00> : vector<32x24xf32>
    %20 = tpu.matmul %19, %18, %cst {dimension_numbers = #tpu.dot_dimension_numbers<[1], [0], [0], [1], [0, 0, 1, 1], [], []>} : vector<32x144xbf16>, vector<144x24xbf16>, vector<32x24xf32> -> vector<32x24xf32>
    %c0_20 = arith.constant 0 : index
    %c0_21 = arith.constant 0 : index
    %21 = vector.load %arg3[%c0_20, %c0_21] : memref<32x1xf32, #tpu.memory_space<vmem>>, vector<32x1xf32>
    %22 = vector.broadcast %21 : vector<32x1xf32> to vector<32x24xf32>
    %23 = arith.addf %20, %22 : vector<32x24xf32>
    %c0_22 = arith.constant 0 : index
    %c0_23 = arith.constant 0 : index
    %c7_24 = arith.constant 7 : index
    %24 = vector.load %arg4[%c0_22, %c0_23, %c7_24] : memref<1x32x42xbf16, #tpu.memory_space<vmem>>, vector<1x32x24xbf16>
    %25 = vector.shape_cast %24 : vector<1x32x24xbf16> to vector<32x24xbf16>
    %26 = arith.extf %25 : vector<32x24xbf16> to vector<32x24xf32>
    %27 = vector.shape_cast %26 : vector<32x24xf32> to vector<4x8x24xf32>
    %cst_25 = arith.constant dense<0.000000e+00> : vector<8x24xf32>
    %28 = vector.multi_reduction <add>, %27, %cst_25 [0] : vector<4x8x24xf32> to vector<8x24xf32>
    %29 = arith.mulf %27, %27 : vector<4x8x24xf32>
    %cst_26 = arith.constant dense<0.000000e+00> : vector<8x24xf32>
    %30 = vector.multi_reduction <add>, %29, %cst_26 [0] : vector<4x8x24xf32> to vector<8x24xf32>
    %cst_27 = arith.constant dense<0.000000e+00> : vector<8xf32>
    %31 = vector.multi_reduction <add>, %28, %cst_27 [1] : vector<8x24xf32> to vector<8xf32>
    %32 = vector.shape_cast %31 : vector<8xf32> to vector<8x1xf32>
    %cst_28 = arith.constant 6.400000e+01 : f32
    %33 = vector.broadcast %cst_28 : f32 to vector<8x1xf32>
    %34 = arith.divf %32, %33 : vector<8x1xf32>
    %cst_29 = arith.constant dense<0.000000e+00> : vector<8xf32>
    %35 = vector.multi_reduction <add>, %30, %cst_29 [1] : vector<8x24xf32> to vector<8xf32>
    %36 = vector.shape_cast %35 : vector<8xf32> to vector<8x1xf32>
    %cst_30 = arith.constant 6.400000e+01 : f32
    %37 = vector.broadcast %cst_30 : f32 to vector<8x1xf32>
    %38 = arith.divf %36, %37 : vector<8x1xf32>
    %39 = arith.mulf %34, %34 : vector<8x1xf32>
    %40 = arith.subf %38, %39 : vector<8x1xf32>
    %41 = vector.shape_cast %34 : vector<8x1xf32> to vector<1x8x1xf32>
    %42 = vector.broadcast %41 : vector<1x8x1xf32> to vector<4x8x24xf32>
    %43 = arith.subf %27, %42 : vector<4x8x24xf32>
    %44 = vector.shape_cast %40 : vector<8x1xf32> to vector<1x8x1xf32>
    %cst_31 = arith.constant 9.99999974E-6 : f32
    %45 = vector.broadcast %cst_31 : f32 to vector<1x8x1xf32>
    %46 = arith.addf %44, %45 : vector<1x8x1xf32>
    %47 = math.rsqrt %46 : vector<1x8x1xf32>
    %48 = vector.broadcast %47 : vector<1x8x1xf32> to vector<4x8x24xf32>
    %49 = arith.mulf %43, %48 : vector<4x8x24xf32>
    %c0_32 = arith.constant 0 : index
    %c0_33 = arith.constant 0 : index
    %c0_34 = arith.constant 0 : index
    %50 = vector.load %arg5[%c0_32, %c0_33, %c0_34] : memref<1x8x1xf32, #tpu.memory_space<vmem>>, vector<1x8x1xf32>
    %51 = vector.shape_cast %50 : vector<1x8x1xf32> to vector<8x1xf32>
    %52 = vector.shape_cast %51 : vector<8x1xf32> to vector<1x8x1xf32>
    %53 = vector.broadcast %52 : vector<1x8x1xf32> to vector<4x8x24xf32>
    %54 = arith.mulf %49, %53 : vector<4x8x24xf32>
    %c0_35 = arith.constant 0 : index
    %c0_36 = arith.constant 0 : index
    %c0_37 = arith.constant 0 : index
    %55 = vector.load %arg6[%c0_35, %c0_36, %c0_37] : memref<1x8x1xf32, #tpu.memory_space<vmem>>, vector<1x8x1xf32>
    %56 = vector.shape_cast %55 : vector<1x8x1xf32> to vector<8x1xf32>
    %57 = vector.shape_cast %56 : vector<8x1xf32> to vector<1x8x1xf32>
    %58 = vector.broadcast %57 : vector<1x8x1xf32> to vector<4x8x24xf32>
    %59 = arith.addf %54, %58 : vector<4x8x24xf32>
    %60 = vector.shape_cast %59 : vector<4x8x24xf32> to vector<32x24xf32>
    %61 = arith.addf %60, %23 : vector<32x24xf32>
    %cst_38 = arith.constant 0.000000e+00 : f32
    %62 = vector.broadcast %cst_38 : f32 to vector<32x24xf32>
    %63 = arith.maximumf %61, %62 : vector<32x24xf32>
    %c0_39 = arith.constant 0 : index
    %c0_40 = arith.constant 0 : index
    %64 = vector.load %arg7[%c0_39, %c0_40] : memref<1x24xf32, #tpu.memory_space<vmem>>, vector<1x24xf32>
    %65 = vector.broadcast %64 : vector<1x24xf32> to vector<32x24xf32>
    %66 = arith.mulf %63, %65 : vector<32x24xf32>
    %cst_41 = arith.constant 0.000000e+00 : f32
    %67 = vector.broadcast %cst_41 : f32 to vector<32x7xf32>
    %cst_42 = arith.constant 0.000000e+00 : f32
    %68 = vector.broadcast %cst_42 : f32 to vector<32x11xf32>
    %69 = tpu.concatenate %67, %66, %68 in 1 : vector<32x7xf32>, vector<32x24xf32>, vector<32x11xf32> -> vector<32x42xf32>
    %70 = arith.truncf %69 : vector<32x42xf32> to vector<32x42xbf16>
    %c0_43 = arith.constant 0 : index
    %c0_44 = arith.constant 0 : index
    %c0_45 = arith.constant 0 : index
    %71 = vector.load %arg8[%c0_43, %c0_44, %c0_45] : memref<1x32x42xbf16, #tpu.memory_space<vmem>>, vector<1x32x42xbf16>
    %72 = vector.shape_cast %71 : vector<1x32x42xbf16> to vector<32x42xbf16>
    %73 = vector.shape_cast %70 : vector<32x42xbf16> to vector<1x32x42xbf16>
    tpu.vector_store %arg8[%c0_43, %c0_44, %c0_45], %73 {strides = array<i32>} : memref<1x32x42xbf16, #tpu.memory_space<vmem>>, vector<1x32x42xbf16>,
    return
  }
  func.func @transform_0(%arg0: i32) -> (i32, i32, i32) {
    %c0_i32 = arith.constant 0 : i32
    %c0_i32_0 = arith.constant 0 : i32
    %c0_i32_1 = arith.constant 0 : i32
    return %arg0, %c0_i32, %c0_i32_0 : i32, i32, i32
  }
  func.func @transform_1(%arg0: i32) -> (i32, i32) {
    %c0_i32 = arith.constant 0 : i32
    %c0_i32_0 = arith.constant 0 : i32
    %c0_i32_1 = arith.constant 0 : i32
    return %c0_i32, %c0_i32_0 : i32, i32
  }
  func.func @transform_2(%arg0: i32) -> (i32, i32) {
    %c0_i32 = arith.constant 0 : i32
    %c0_i32_0 = arith.constant 0 : i32
    %c0_i32_1 = arith.constant 0 : i32
    return %c0_i32, %c0_i32_0 : i32, i32
  }
  func.func @transform_3(%arg0: i32) -> (i32, i32, i32) {
    %c0_i32 = arith.constant 0 : i32
    %c0_i32_0 = arith.constant 0 : i32
    %c0_i32_1 = arith.constant 0 : i32
    return %arg0, %c0_i32, %c0_i32_0 : i32, i32, i32
  }
  func.func @transform_4(%arg0: i32) -> (i32, i32, i32) {
    %c0_i32 = arith.constant 0 : i32
    %c0_i32_0 = arith.constant 0 : i32
    %c0_i32_1 = arith.constant 0 : i32
    return %arg0, %c0_i32, %c0_i32_0 : i32, i32, i32
  }
  func.func @transform_5(%arg0: i32) -> (i32, i32, i32) {
    %c0_i32 = arith.constant 0 : i32
    %c0_i32_0 = arith.constant 0 : i32
    %c0_i32_1 = arith.constant 0 : i32
    return %arg0, %c0_i32, %c0_i32_0 : i32, i32, i32
  }
  func.func @transform_6(%arg0: i32) -> (i32, i32) {
    %c0_i32 = arith.constant 0 : i32
    %c0_i32_0 = arith.constant 0 : i32
    %c0_i32_1 = arith.constant 0 : i32
    return %c0_i32, %c0_i32_0 : i32, i32
  }
  func.func @transform_7(%arg0: i32) -> (i32, i32, i32) {
    %c0_i32 = arith.constant 0 : i32
    %c0_i32_0 = arith.constant 0 : i32
    %c0_i32_1 = arith.constant 0 : i32
    return %arg0, %c0_i32, %c0_i32_0 : i32, i32, i32
  }
}

module attributes {stable_mosaic.version = 11 : i64} {
  func.func @_conv_bias_kernel(%arg0: i32, %arg1: memref<1x32x42xbf16, #tpu.memory_space<vmem>>, %arg2: memref<16x288xbf16, #tpu.memory_space<vmem>>, %arg3: memref<16x1xf32, #tpu.memory_space<vmem>>, %arg4: memref<1x16x24xf32, #tpu.memory_space<vmem>>) attributes {dimension_semantics = [#tpu.dimension_semantics<parallel>], iteration_bounds = array<i64: 2>, scalar_prefetch = 0 : i64, scratch_operands = 0 : i64, tpu.core_type = #tpu.core_type<tc>, window_params = [{transform_indices = @transform_0, window_bounds = array<i64: 1, 32, 42>}, {pipeline_mode = #tpu.pipeline_mode<synchronous>, transform_indices = @transform_1, window_bounds = array<i64: 16, 288>}, {pipeline_mode = #tpu.pipeline_mode<synchronous>, transform_indices = @transform_2, window_bounds = array<i64: 16, 1>}, {transform_indices = @transform_3, window_bounds = array<i64: 1, 16, 24>}]} {
    %c0 = arith.constant 0 : index
    %c0_0 = arith.constant 0 : index
    %c0_1 = arith.constant 0 : index
    %0 = vector.load %arg1[%c0, %c0_0, %c0_1] : memref<1x32x42xbf16, #tpu.memory_space<vmem>>, vector<1x32x24xbf16>
    %1 = vector.shape_cast %0 : vector<1x32x24xbf16> to vector<32x24xbf16>
    %c0_2 = arith.constant 0 : index
    %c0_3 = arith.constant 0 : index
    %c1 = arith.constant 1 : index
    %2 = vector.load %arg1[%c0_2, %c0_3, %c1] : memref<1x32x42xbf16, #tpu.memory_space<vmem>>, vector<1x32x24xbf16>
    %3 = vector.shape_cast %2 : vector<1x32x24xbf16> to vector<32x24xbf16>
    %c0_4 = arith.constant 0 : index
    %c0_5 = arith.constant 0 : index
    %c2 = arith.constant 2 : index
    %4 = vector.load %arg1[%c0_4, %c0_5, %c2] : memref<1x32x42xbf16, #tpu.memory_space<vmem>>, vector<1x32x24xbf16>
    %5 = vector.shape_cast %4 : vector<1x32x24xbf16> to vector<32x24xbf16>
    %c0_6 = arith.constant 0 : index
    %c0_7 = arith.constant 0 : index
    %c6 = arith.constant 6 : index
    %6 = vector.load %arg1[%c0_6, %c0_7, %c6] : memref<1x32x42xbf16, #tpu.memory_space<vmem>>, vector<1x32x24xbf16>
    %7 = vector.shape_cast %6 : vector<1x32x24xbf16> to vector<32x24xbf16>
    %c0_8 = arith.constant 0 : index
    %c0_9 = arith.constant 0 : index
    %c7 = arith.constant 7 : index
    %8 = vector.load %arg1[%c0_8, %c0_9, %c7] : memref<1x32x42xbf16, #tpu.memory_space<vmem>>, vector<1x32x24xbf16>
    %9 = vector.shape_cast %8 : vector<1x32x24xbf16> to vector<32x24xbf16>
    %c0_10 = arith.constant 0 : index
    %c0_11 = arith.constant 0 : index
    %c8 = arith.constant 8 : index
    %10 = vector.load %arg1[%c0_10, %c0_11, %c8] : memref<1x32x42xbf16, #tpu.memory_space<vmem>>, vector<1x32x24xbf16>
    %11 = vector.shape_cast %10 : vector<1x32x24xbf16> to vector<32x24xbf16>
    %c0_12 = arith.constant 0 : index
    %c0_13 = arith.constant 0 : index
    %c12 = arith.constant 12 : index
    %12 = vector.load %arg1[%c0_12, %c0_13, %c12] : memref<1x32x42xbf16, #tpu.memory_space<vmem>>, vector<1x32x24xbf16>
    %13 = vector.shape_cast %12 : vector<1x32x24xbf16> to vector<32x24xbf16>
    %c0_14 = arith.constant 0 : index
    %c0_15 = arith.constant 0 : index
    %c13 = arith.constant 13 : index
    %14 = vector.load %arg1[%c0_14, %c0_15, %c13] : memref<1x32x42xbf16, #tpu.memory_space<vmem>>, vector<1x32x24xbf16>
    %15 = vector.shape_cast %14 : vector<1x32x24xbf16> to vector<32x24xbf16>
    %c0_16 = arith.constant 0 : index
    %c0_17 = arith.constant 0 : index
    %c14 = arith.constant 14 : index
    %16 = vector.load %arg1[%c0_16, %c0_17, %c14] : memref<1x32x42xbf16, #tpu.memory_space<vmem>>, vector<1x32x24xbf16>
    %17 = vector.shape_cast %16 : vector<1x32x24xbf16> to vector<32x24xbf16>
    %18 = tpu.concatenate %1, %3, %5, %7, %9, %11, %13, %15, %17 in 0 : vector<32x24xbf16>, vector<32x24xbf16>, vector<32x24xbf16>, vector<32x24xbf16>, vector<32x24xbf16>, vector<32x24xbf16>, vector<32x24xbf16>, vector<32x24xbf16>, vector<32x24xbf16> -> vector<288x24xbf16>
    %c0_18 = arith.constant 0 : index
    %c0_19 = arith.constant 0 : index
    %19 = vector.load %arg2[%c0_18, %c0_19] : memref<16x288xbf16, #tpu.memory_space<vmem>>, vector<16x288xbf16>
    %cst = arith.constant dense<0.000000e+00> : vector<16x24xf32>
    %20 = tpu.matmul %19, %18, %cst {dimension_numbers = #tpu.dot_dimension_numbers<[1], [0], [0], [1], [0, 0, 1, 1], [], []>} : vector<16x288xbf16>, vector<288x24xbf16>, vector<16x24xf32> -> vector<16x24xf32>
    %c0_20 = arith.constant 0 : index
    %c0_21 = arith.constant 0 : index
    %21 = vector.load %arg3[%c0_20, %c0_21] : memref<16x1xf32, #tpu.memory_space<vmem>>, vector<16x1xf32>
    %22 = vector.broadcast %21 : vector<16x1xf32> to vector<16x24xf32>
    %23 = arith.addf %20, %22 : vector<16x24xf32>
    %c0_22 = arith.constant 0 : index
    %c0_23 = arith.constant 0 : index
    %c0_24 = arith.constant 0 : index
    %24 = vector.load %arg4[%c0_22, %c0_23, %c0_24] : memref<1x16x24xf32, #tpu.memory_space<vmem>>, vector<1x16x24xf32>
    %25 = vector.shape_cast %24 : vector<1x16x24xf32> to vector<16x24xf32>
    %26 = vector.shape_cast %23 : vector<16x24xf32> to vector<1x16x24xf32>
    tpu.vector_store %arg4[%c0_22, %c0_23, %c0_24], %26 {strides = array<i32>} : memref<1x16x24xf32, #tpu.memory_space<vmem>>, vector<1x16x24xf32>,
    return
  }
  func.func @transform_0(%arg0: i32) -> (i32, i32, i32) {
    %c0_i32 = arith.constant 0 : i32
    %c0_i32_0 = arith.constant 0 : i32
    %c0_i32_1 = arith.constant 0 : i32
    return %arg0, %c0_i32, %c0_i32_0 : i32, i32, i32
  }
  func.func @transform_1(%arg0: i32) -> (i32, i32) {
    %c0_i32 = arith.constant 0 : i32
    %c0_i32_0 = arith.constant 0 : i32
    %c0_i32_1 = arith.constant 0 : i32
    return %c0_i32, %c0_i32_0 : i32, i32
  }
  func.func @transform_2(%arg0: i32) -> (i32, i32) {
    %c0_i32 = arith.constant 0 : i32
    %c0_i32_0 = arith.constant 0 : i32
    %c0_i32_1 = arith.constant 0 : i32
    return %c0_i32, %c0_i32_0 : i32, i32
  }
  func.func @transform_3(%arg0: i32) -> (i32, i32, i32) {
    %c0_i32 = arith.constant 0 : i32
    %c0_i32_0 = arith.constant 0 : i32
    %c0_i32_1 = arith.constant 0 : i32
    return %arg0, %c0_i32, %c0_i32_0 : i32, i32, i32
  }
}

module attributes {stable_mosaic.version = 11 : i64} {
  func.func @_recover_stats_kernel(%arg0: i32, %arg1: memref<1x1x256xf32, #tpu.memory_space<vmem>>, %arg2: memref<1x1x256xf32, #tpu.memory_space<vmem>>, %arg3: memref<1x1x8xf32, #tpu.memory_space<vmem>>) attributes {dimension_semantics = [#tpu.dimension_semantics<parallel>], iteration_bounds = array<i64: 2>, scalar_prefetch = 0 : i64, scratch_operands = 0 : i64, tpu.core_type = #tpu.core_type<tc>, window_params = [{transform_indices = @transform_0, window_bounds = array<i64: 1, 1, 256>}, {transform_indices = @transform_1, window_bounds = array<i64: 1, 1, 256>}, {transform_indices = @transform_2, window_bounds = array<i64: 1, 1, 8>}]} {
    %c0 = arith.constant 0 : index
    %c0_0 = arith.constant 0 : index
    %c0_1 = arith.constant 0 : index
    %0 = vector.load %arg1[%c0, %c0_0, %c0_1] : memref<1x1x256xf32, #tpu.memory_space<vmem>>, vector<1x1x256xf32>
    %1 = vector.shape_cast %0 : vector<1x1x256xf32> to vector<1x256xf32>
    %c0_2 = arith.constant 0 : index
    %c0_3 = arith.constant 0 : index
    %c0_4 = arith.constant 0 : index
    %2 = vector.load %arg2[%c0_2, %c0_3, %c0_4] : memref<1x1x256xf32, #tpu.memory_space<vmem>>, vector<1x1x256xf32>
    %3 = vector.shape_cast %2 : vector<1x1x256xf32> to vector<1x256xf32>
    %cst = arith.constant -9.99999993E-9 : f32
    %4 = vector.broadcast %cst : f32 to vector<1x256xf32>
    %5 = arith.cmpf ogt, %3, %4 : vector<1x256xf32>
    %cst_5 = arith.constant 1.010000e+01 : f32
    %6 = vector.broadcast %cst_5 : f32 to vector<1x256xf32>
    %7 = arith.cmpf olt, %3, %6 : vector<1x256xf32>
    %8 = arith.andi %5, %7 : vector<1x256xi1>
    %9 = arith.extui %8 : vector<1x256xi1> to vector<1x256xi32>
    %10 = arith.sitofp %9 : vector<1x256xi32> to vector<1x256xf32>
    %11 = arith.mulf %10, %1 : vector<1x256xf32>
    %12 = arith.mulf %11, %1 : vector<1x256xf32>
    %cst_6 = arith.constant dense<0.000000e+00> : vector<1xf32>
    %13 = vector.multi_reduction <add>, %12, %cst_6 [1] : vector<1x256xf32> to vector<1xf32>
    %14 = vector.shape_cast %13 : vector<1xf32> to vector<1x1xf32>
    %cst_7 = arith.constant dense<0.000000e+00> : vector<1xf32>
    %15 = vector.multi_reduction <add>, %11, %cst_7 [1] : vector<1x256xf32> to vector<1xf32>
    %16 = vector.shape_cast %15 : vector<1xf32> to vector<1x1xf32>
    %cst_8 = arith.constant dense<0.000000e+00> : vector<1xf32>
    %17 = vector.multi_reduction <add>, %10, %cst_8 [1] : vector<1x256xf32> to vector<1xf32>
    %18 = vector.shape_cast %17 : vector<1xf32> to vector<1x1xf32>
    %19 = arith.mulf %11, %3 : vector<1x256xf32>
    %cst_9 = arith.constant dense<0.000000e+00> : vector<1xf32>
    %20 = vector.multi_reduction <add>, %19, %cst_9 [1] : vector<1x256xf32> to vector<1xf32>
    %21 = vector.shape_cast %20 : vector<1xf32> to vector<1x1xf32>
    %22 = arith.mulf %10, %3 : vector<1x256xf32>
    %cst_10 = arith.constant dense<0.000000e+00> : vector<1xf32>
    %23 = vector.multi_reduction <add>, %22, %cst_10 [1] : vector<1x256xf32> to vector<1xf32>
    %24 = vector.shape_cast %23 : vector<1xf32> to vector<1x1xf32>
    %cst_11 = arith.constant 0.000000e+00 : f32
    %25 = vector.broadcast %cst_11 : f32 to vector<1x3xf32>
    %26 = tpu.concatenate %14, %16, %18, %21, %24, %25 in 1 : vector<1x1xf32>, vector<1x1xf32>, vector<1x1xf32>, vector<1x1xf32>, vector<1x1xf32>, vector<1x3xf32> -> vector<1x8xf32>
    %c0_12 = arith.constant 0 : index
    %c0_13 = arith.constant 0 : index
    %c0_14 = arith.constant 0 : index
    %27 = vector.load %arg3[%c0_12, %c0_13, %c0_14] : memref<1x1x8xf32, #tpu.memory_space<vmem>>, vector<1x1x8xf32>
    %28 = vector.shape_cast %27 : vector<1x1x8xf32> to vector<1x8xf32>
    %29 = vector.shape_cast %26 : vector<1x8xf32> to vector<1x1x8xf32>
    tpu.vector_store %arg3[%c0_12, %c0_13, %c0_14], %29 {strides = array<i32>} : memref<1x1x8xf32, #tpu.memory_space<vmem>>, vector<1x1x8xf32>,
    return
  }
  func.func @transform_0(%arg0: i32) -> (i32, i32, i32) {
    %c0_i32 = arith.constant 0 : i32
    %c0_i32_0 = arith.constant 0 : i32
    %c0_i32_1 = arith.constant 0 : i32
    return %arg0, %c0_i32, %c0_i32_0 : i32, i32, i32
  }
  func.func @transform_1(%arg0: i32) -> (i32, i32, i32) {
    %c0_i32 = arith.constant 0 : i32
    %c0_i32_0 = arith.constant 0 : i32
    %c0_i32_1 = arith.constant 0 : i32
    return %arg0, %c0_i32, %c0_i32_0 : i32, i32, i32
  }
  func.func @transform_2(%arg0: i32) -> (i32, i32, i32) {
    %c0_i32 = arith.constant 0 : i32
    %c0_i32_0 = arith.constant 0 : i32
    %c0_i32_1 = arith.constant 0 : i32
    return %arg0, %c0_i32, %c0_i32_0 : i32, i32, i32
  }
}

</mosaic_0001>

<bundles_post_ra>
// kernel: _lambda_.5
= control target key start
LH: loop header
LB: loop body
LE: loop exit
PB: predicated region body
PF: predicated region fallthrough
CT: control target
= control target key end

     0   :  { %s331_s12 = smov 0   ;;  %s358_s0 = inlined_call_operand.vmem [shape: bf16[2,16,110], index: 0, kind: input, shape index: {}]   ;;  %s359_s1 = inlined_call_operand.vmem [shape: bf16[8,64], index: 1, kind: input, shape index: {}]   ;;  %s360_s2 = inlined_call_operand.vmem [shape: f32[8,1], index: 2, kind: input, shape index: {}]   ;;  %s361_s3 = inlined_call_operand.vmem [shape: bf16[2,8,80], index: 3, kind: output, shape index: {}]  }
   0x1 LB: > { %s268_s13 = sadd.s32 4294967295, %s305_s12   ;;  %p272_p0 = scmp.ge.s32.totalorder %s305_s12, 1  ;;  %s305_s12 = sphi %s331_s12, %s13_s12  }
   0x2   : > { %p137_p1 = scmp.lt.s32.totalorder %s305_s12, 3 }
   0x4   : > { %p138_p2 = pnand %p272_p0, %p137_p1 }
   0x5   : > { %p160_p3 = scmp.lt.s32.totalorder (!%p138_p2), %s268_s13, 1  ;;  %s307_s18 = smov (!%p138_p2), 117  }
   0x6   : > { %141 = sbr.rel (%p138_p2) target bundleno = 283 (0x11b), region = 32  ;;  %s308_s19 = smov (!%p138_p2), 127  }
   0x7   : > { %s309_s20 = smov (!%p138_p2), 118  }
   0xb   : > { %s363_s13 = smov (!%p160_p3, %s268_s13), 1  ;;  %v188_v1 = vld [vmem:[%s360_s2] sm:$0xff]  ;;  %v310_v2 = vmov 0   ;;  %vm194_vm0 = vcmask 523264   ;;  %vm213_vm1 = vcmask 650240  }
   0xc   : > { %s283_s14 = sshll.u32 %s363_s13, 3  ;;  %297 = vset.pattern.permute.xlu1 %v310_v2  ;;  %298 = vset.pattern.permute.xlu0 %v310_v2  ;;  %v187_v6 = vld [vmem:[%s359_s1] sm:$0xf]  ;;  %s275_s25 = sshll.u32 %s363_s13, 2 }
   0xd   : > { %s164_s17 = scalar_lea.vmem %s358_s0, %s283_s14  ;;  %s168_s28 = scalar_lea.vmem %s361_s3, %s275_s25 }
   0xe   : > { %v284_v0 = vld [vmem:[%s164_s17] sm:$0xff] }
   0xf   : > { %184 = vrot.lane.b32.xlu0 %v284_v0, %s307_s18  ;;  %178 = vrot.lane.b32.xlu1 %v284_v0, %s308_s19 }
  0x17   : > { %181 = vrot.lane.b32.xlu0 %v284_v0, %s309_s20  ;;  %191 = vperm.xlu1 %297, %v188_v1  }
  0x81   : > { %v185_v3 = vpop.permute.xlu0 %184  ;;  %v179_v5 = vpop.permute.xlu1 %178 }
  0x82   : > { %202 = vmatpush.bf16.msra.mxu0 %v185_v3 }
  0x89   : > { %v182_v4 = vpop.permute.xlu0 %181  ;;  %v192_v7 = vpop.permute.xlu1 %191 }
  0x8a   : > { %203 = vmatpush.bf16.msra.mxu0 %v182_v4 }
  0x8e   : > { %204 = vmatpush.bf16.msra.mxu0 %v179_v5 }
  0x92   : > { %205 = vmatpush.bf16.msra.mxu0 %v284_v0 }
  0x95   : > { %280 = vmatmul.msk.bf16.vlgmr.msra.gmra.mxu0 %vm194_vm0, %v187_v6 }
 0x112   : > { %v207_v8 = vpop.f32.mrf.mxu0 }
 0x113   : > { %v208_v9 = vadd.f32 %v207_v8, %v192_v7 }
 0x115   : > { %v211_v10 = vmax.f32 %v208_v9, 0.0 }
 0x117   : > { %v212_v11 = vpack.c.bf16 %v211_v10, %v211_v10 }
 0x119   : > { %214 = vst.msk [vmem:[%s168_s28] sm:$0xf] %vm213_vm1, %v212_v11 }
 0x11a   : > { %v209_v12 = vpop.f32.mrf.mxu0 }
 0x11b PF: > { %s13_s12 = sadd.s32 1, %s305_s12  }
 0x11c   : > { %p10_p4 = scmp.ge.s32.totalorder %s13_s12, 4  }
 0x11e   :  { %12 = sbr.rel (!%p10_p4) target bundleno = 1 (0x1), region = 62 }

// kernel: tile.12
= control target key start
LH: loop header
LB: loop body
LE: loop exit
PB: predicated region body
PF: predicated region fallthrough
CT: control target
= control target key end

     0   :  { %s22_s0 = inlined_call_operand.vmem [shape: f32[8], index: 0, kind: input, shape index: {}]   ;;  %s23_s1 = inlined_call_operand.vmem [shape: f32[4,8], index: 1, kind: output, shape index: {}]  }
   0x1   :  { %v4_v0 = vld [vmem:[%s22_s0] ss:$0 sm:$0xff] }
   0x2   :  { %5 = vst [vmem:[%s23_s1] sm:$0xf] %v4_v0 }

// kernel: tile.0
= control target key start
LH: loop header
LB: loop body
LE: loop exit
PB: predicated region body
PF: predicated region fallthrough
CT: control target
= control target key end

     0   :  { %s66_s8 = smov 125   ;;  %s67_s9 = smov 123   ;;  %vm7_vm0 = vcmask 7168   ;;  %s117_s0 = inlined_call_operand.vmem [shape: f32[4,8], index: 0, kind: input, shape index: {}]   ;;  %s118_s1 = inlined_call_operand.vmem [shape: f32[32,1], index: 1, kind: output, shape index: {}]  }
   0x1   :  { %v4_v0 = vld [vmem:[%s117_s0] sm:$0xf]  ;;  %s65_s0 = smov 127   ;;  %s68_s10 = smov 126  }
   0x2   :  { %5 = vst [vmem:[#allocation0] sm:$0xf] %v4_v0  ;;  %s69_s11 = smov 124   ;;  %s70_s12 = smov 122  }
   0x3   :  { %s71_s13 = smov 121  }
   0x9   :  { %v9_v1 = vld [vmem:[#allocation0] sm:$0xf]  }
   0xa   :  { %v21_v2 = vld [vmem:[#allocation0] sm:$0xf]   ;;  %10 = vrot.lane.b32.xlu0 %v9_v1, %s65_s0 }
   0xb   :  { %22 = vrot.lane.b32.xlu1 %v21_v2, %s66_s8  ;;  %v33_v3 = vld [vmem:[#allocation0] sm:$0xf]  }
   0xc   :  { %34 = vrot.lane.b32.xlu2 %v33_v3, %s67_s9  ;;  %v15_v4 = vld [vmem:[#allocation0] sm:$0xf]  }
   0xd   :  { %v27_v5 = vld [vmem:[#allocation0] sm:$0xf]  }
   0xe   :  { %v39_v6 = vld [vmem:[#allocation0] sm:$0xf]  }
   0xf   :  { %v45_v7 = vld [vmem:[#allocation0] sm:$0xf]  }
  0x10   :  { %v6_v8 = vld [vmem:[#allocation0] sm:$0xf]  }
  0x11   :  { %8 = vst.msk [vmem:[%s118_s1] ss:$8 sm:$0xf] %vm7_vm0, %v6_v8  }
  0x12   :  { %16 = vrot.lane.b32.xlu0 %v15_v4, %s68_s10 }
  0x13   :  { %28 = vrot.lane.b32.xlu1 %v27_v5, %s69_s11 }
  0x14   :  { %40 = vrot.lane.b32.xlu2 %v39_v6, %s70_s12 }
  0x1a   :  { %46 = vrot.lane.b32.xlu0 %v45_v7, %s71_s13 }
  0x66   :  { %v35_v9 = vpop.permute.xlu2 %34  }
  0x67   :  { %55 = vst.msk [vmem:[%s118_s1 + $0x5] ss:$8 sm:$0xf] %vm7_vm0, %v35_v9  }
  0x6e   :  { %v41_v10 = vpop.permute.xlu2 %40  }
  0x6f   :  { %56 = vst.msk [vmem:[%s118_s1 + $0x6] ss:$8 sm:$0xf] %vm7_vm0, %v41_v10  }
  0x7c   :  { %v11_v11 = vpop.permute.xlu0 %10  }
  0x7d   :  { %v23_v12 = vpop.permute.xlu1 %22   ;;  %51 = vst.msk [vmem:[%s118_s1 + $0x1] ss:$8 sm:$0xf] %vm7_vm0, %v11_v11  }
  0x7e   :  { %53 = vst.msk [vmem:[%s118_s1 + $0x3] ss:$8 sm:$0xf] %vm7_vm0, %v23_v12  }
  0x84   :  { %v17_v13 = vpop.permute.xlu0 %16  }
  0x85   :  { %v29_v14 = vpop.permute.xlu1 %28   ;;  %52 = vst.msk [vmem:[%s118_s1 + $0x2] ss:$8 sm:$0xf] %vm7_vm0, %v17_v13  }
  0x86   :  { %54 = vst.msk [vmem:[%s118_s1 + $0x4] ss:$8 sm:$0xf] %vm7_vm0, %v29_v14  }
  0x8c   :  { %v47_v15 = vpop.permute.xlu0 %46  }
  0x8d   :  { %57 = vst.msk [vmem:[%s118_s1 + $0x7] ss:$8 sm:$0xf] %vm7_vm0, %v47_v15  }

// kernel: _lambda_.6
= control target key start
LH: loop header
LB: loop body
LE: loop exit
PB: predicated region body
PF: predicated region fallthrough
CT: control target
= control target key end

     0   :  { %s664_s21 = smov 0   ;;  %s728_s0 = inlined_call_operand.vmem [shape: bf16[2,32,42], index: 0, kind: input, shape index: {}]   ;;  %s729_s1 = inlined_call_operand.vmem [shape: bf16[16,128], index: 1, kind: input, shape index: {}]   ;;  %s730_s2 = inlined_call_operand.vmem [shape: f32[16,1], index: 2, kind: input, shape index: {}]   ;;  %s731_s3 = inlined_call_operand.vmem [shape: f32[2,16,1], index: 3, kind: input, shape index: {}]   ;;  %s732_s4 = inlined_call_operand.vmem [shape: f32[2,16,1], index: 4, kind: input, shape index: {}]   ;;  %s733_s5 = inlined_call_operand.vmem [shape: f32[1,24], index: 5, kind: input, shape index: {}]   ;;  %s734_s6 = inlined_call_operand.vmem [shape: bf16[2,16,42], index: 6, kind: output, shape index: {}]  }
   0x1 LB: > { %s552_s22 = sadd.s32 4294967295, %s621_s21   ;;  %p556_p0 = scmp.ge.s32.totalorder %s621_s21, 1  ;;  %s621_s21 = sphi %s664_s21, %s16_s21  }
   0x2   : > { %p232_p1 = scmp.lt.s32.totalorder %s621_s21, 3 }
   0x4   : > { %p233_p2 = pnand %p556_p0, %p232_p1 }
   0x5   : > { %p272_p3 = scmp.lt.s32.totalorder (!%p233_p2), %s552_s22, 1  ;;  %s623_s27 = smov (!%p233_p2), 121  }
   0x6   : > { %236 = sbr.rel (%p233_p2) target bundleno = 581 (0x245), region = 44  ;;  %s624_s28 = smov (!%p233_p2), 122  }
   0x7   : > { %s625_s29 = smov (!%p233_p2), 127   ;;  %s628_s20 = smov (!%p233_p2), 7  }
   0xb   : > { %s736_s22 = smov (!%p272_p3, %s552_s22), 1  ;;  %v328_v4 = vld [vmem:[%s730_s2] sm:$0xff]  ;;  %v329_v5 = vld [vmem:[%s730_s2 + $0x8] sm:$0xff]  ;;  %v626_v6 = vmov 0   ;;  %vm368_vm0 = vcmask 195584   ;;  %v627_v33 = vmov 16.0  }
   0xc   : > { %s675_s23 = sshll.u32 %s736_s22, 4  ;;  %600 = vset.pattern.permute.xlu0 %v626_v6  ;;  %601 = vset.pattern.permute.xlu1 %v626_v6  ;;  %v585_v12 = vld [vmem:[%s729_s1] sm:$0xff]  ;;  %609 = vrcp.f32 %v627_v33  ;;  %vm462_vm8 = vcmask 56320   ;;  %vm465_vm9 = vcmask 252928   ;;  %vm470_vm10 = vcmask 338944  }
   0xd   : > { %s276_s26 = scalar_lea.vmem %s728_s0, %s675_s23  ;;  %s685_s8 = scalar_lea.vmem %s731_s3, %s675_s23  ;;  %602 = vset.pattern.permute.xlu2 %v626_v6  ;;  %v700_v16 = vld [vmem:[%s733_s5] ss:$0 sm:$0xff] }
   0xe   : > { %v584_v0 = vld [vmem:[%s276_s26 + $0x8] sm:$0xff]  ;;  %v583_v1 = vld [vmem:[%s276_s26] sm:$0xff]  ;;  %s286_s19 = scalar_lea.vmem %s732_s4, %s675_s23  ;;  %s582_s23 = sshll.u32 %s736_s22, 3 }
   0xf   : > { %322 = vrot.lane.b32.xlu0 %v584_v0, %s623_s27  ;;  %316 = vrot.lane.b32.xlu1 %v584_v0, %s624_s28  ;;  %v424_v7 = vld [vmem:[%s685_s8] sm:$0xff]  ;;  %v425_v31 = vld [vmem:[%s685_s8 + $0x8] sm:$0xff]  ;;  %s291_s26 = scalar_lea.vmem %s734_s6, %s582_s23 }
  0x10   : > { %310 = vrot.lane.b32.xlu2 %v584_v0, %s625_s29  ;;  %v438_v30 = vld [vmem:[%s286_s19] sm:$0xff]  ;;  %v439_v32 = vld [vmem:[%s286_s19 + $0x8] sm:$0xff] }
  0x12   : > { %v610_v34 = vpop.eup %609 }
  0x13   : > { %v376_v35 = vmul.f32 16.0, %v610_v34  ;;  %vm380_vm1 = vweird.f32 %v610_v34 }
  0x15   : > { %v377_v36 = vsub.f32 1.0, %v376_v35 }
  0x17   : > { %320 = vrot.lane.b32.xlu0 %v583_v1, %s623_s27  ;;  %314 = vrot.lane.b32.xlu1 %v583_v1, %s624_s28  ;;  %v378_v37 = vmul.f32 %v610_v34, %v377_v36 }
  0x18   : > { %308 = vrot.lane.b32.xlu2 %v583_v1, %s625_s29 }
  0x19   : > { %v379_v39 = vadd.f32 %v610_v34, %v378_v37 }
  0x1b   : > { %v381_v40 = vsel %vm380_vm1, %v610_v34, %v379_v39 }
  0x1f   : > { %332 = vperm.xlu0 %600, %v328_v4   ;;  %337 = vperm.xlu1 %601, %v329_v5  }
  0x20   : > { %428 = vperm.xlu2 %602, %v424_v7  }
  0x6a   : > { %v311_v9 = vpop.permute.xlu2 %310 }
  0x72   : > { %v309_v11 = vpop.permute.xlu2 %308 }
  0x7a   : > { %v429_v38 = vpop.permute.xlu2 %428 }
  0x81   : > { %v323_v2 = vpop.permute.xlu0 %322  ;;  %v317_v3 = vpop.permute.xlu1 %316 }
  0x82   : > { %346 = vmatpush.bf16.msra.mxu0 %v323_v2 }
  0x89   : > { %v321_v8 = vpop.permute.xlu0 %320  ;;  %v315_v10 = vpop.permute.xlu1 %314 }
  0x8a   : > { %347 = vmatpush.bf16.msra.mxu0 %v321_v8 }
  0x8e   : > { %348 = vmatpush.bf16.msra.mxu0 %v317_v3 }
  0x91   : > { %v333_v13 = vpop.permute.xlu0 %332  ;;  %v338_v19 = vpop.permute.xlu1 %337 }
  0x92   : > { %349 = vmatpush.bf16.msra.mxu0 %v315_v10 }
  0x96   : > { %350 = vmatpush.bf16.msra.mxu0 %v311_v9 }
  0x9a   : > { %351 = vmatpush.bf16.msra.mxu0 %v309_v11 }
  0x9e   : > { %352 = vmatpush.bf16.msra.mxu0 %v584_v0 }
  0xa2   : > { %353 = vmatpush.bf16.msra.mxu0 %v583_v1 }
  0xa5   : > { %354 = vmatmul.bf16.vlgmr.msra.gmra.mxu0 %v585_v12 }
 0x122   : > { %v355_v14 = vpop.f32.mrf.mxu0 }
 0x123   : > { %v356_v15 = vadd.f32 %v355_v14, %v333_v13 }
 0x125   : > { %v702_v17 = vmax.f32 %v356_v15, 0.0 }
 0x127   : > { %v366_v18 = vmul.f32 %v700_v16, %v702_v17 }
 0x129   : > { %v369_v20 = vsel %vm368_vm0, %v366_v18, 0.0  ;;  %v384_v21 = vmul.f32 %v366_v18, %v702_v17 }
 0x12a   : > { %v357_v22 = vpop.f32.mrf.mxu0  ;;  %370 = vadd.xlane.f32.xlu2 %v369_v20 }
 0x12b   : > { %v358_v23 = vadd.f32 %v357_v22, %v338_v19  ;;  %v386_v24 = vsel %vm368_vm0, %v384_v21, 0.0 }
 0x12c   : > { %387 = vadd.xlane.f32.xlu0 %v386_v24 }
 0x12d   : > { %v707_v25 = vmax.f32 %v358_v23, 0.0 }
 0x12f   : > { %v367_v26 = vmul.f32 %v700_v16, %v707_v25 }
 0x131   : > { %v372_v27 = vsel %vm368_vm0, %v367_v26, 0.0  ;;  %v385_v28 = vmul.f32 %v367_v26, %v707_v25 }
 0x132   : > { %373 = vadd.xlane.f32.xlu1 %v372_v27 }
 0x133   : > { %v389_v29 = vsel %vm368_vm0, %v385_v28, 0.0 }
 0x134   : > { %390 = vadd.xlane.f32.xlu2 %v389_v29 }
 0x140   : > { %442 = vperm.xlu0 %600, %v438_v30  }
 0x14b   : > { %433 = vperm.xlu1 %601, %v425_v31  }
 0x14c   : > { %447 = vperm.xlu2 %602, %v439_v32  }
 0x19d   : > { %v371_v41 = vpop.xlane.xlu2 %370 }
 0x19e   : > { %v382_v42 = vmul.f32 %v381_v40, %v371_v41 }
 0x19f   : > { %v388_v43 = vpop.xlane.xlu0 %387 }
 0x1a0   : > { %v394_v44 = vmul.f32 %v382_v42, %v382_v42  ;;  %v392_v45 = vmul.f32 %v388_v43, %v381_v40  ;;  %v398_v1 = vsub.f32 %v702_v17, %v382_v42 }
 0x1a2   : > { %v396_v46 = vsub.f32 %v392_v45, %v394_v44 }
 0x1a4   : > { %v400_v47 = vadd.f32 1e-05, %v396_v46 }
 0x1a5   : > { %v374_v48 = vpop.xlane.xlu1 %373 }
 0x1a6   : > { %611 = vrsqrt.f32 %v400_v47  ;;  %v383_v49 = vmul.f32 %v381_v40, %v374_v48  ;;  %vm408_vm3 = vweird.f32 %v400_v47 }
 0x1a7   : > { %v391_v50 = vpop.xlane.xlu2 %390 }
 0x1a8   : > { %v395_v51 = vmul.f32 %v383_v49, %v383_v49  ;;  %v393_v52 = vmul.f32 %v391_v50, %v381_v40  ;;  %v399_v6 = vsub.f32 %v707_v25, %v383_v49 }
 0x1aa   : > { %v397_v53 = vsub.f32 %v393_v52, %v395_v51 }
 0x1ac   : > { %v612_v54 = vpop.eup %611  ;;  %v401_v55 = vadd.f32 1e-05, %v397_v53 }
 0x1ad   : > { %v403_v56 = vmul.f32 %v612_v54, %v400_v47  ;;  %vm409_vm2 = vweird.f32 %v612_v54 }
 0x1ae   : > { %613 = vrsqrt.f32 %v401_v55  ;;  %vm410_vm4 = vmor %vm408_vm3, %vm409_vm2  ;;  %vm418_vm6 = vweird.f32 %v401_v55 }
 0x1af   : > { %v404_v57 = vmul.f32 %v612_v54, %v403_v56  ;;  %v448_v14 = vpop.permute.xlu2 %447 }
 0x1b1   : > { %v405_v58 = vmul.f32 0.5, %v404_v57 }
 0x1b2   : > { %v443_v10 = vpop.permute.xlu0 %442 }
 0x1b3   : > { %v406_v59 = vsub.f32 1.5, %v405_v58 }
 0x1b4   : > { %v614_v60 = vpop.eup %613 }
 0x1b5   : > { %v413_v61 = vmul.f32 %v614_v60, %v401_v55  ;;  %v407_v62 = vmul.f32 %v612_v54, %v406_v59  ;;  %vm419_vm5 = vweird.f32 %v614_v60 }
 0x1b6   : > { %vm420_vm7 = vmor %vm418_vm6, %vm419_vm5 }
 0x1b7   : > { %v414_v63 = vmul.f32 %v614_v60, %v413_v61  ;;  %v411_v0 = vsel %vm410_vm4, %v612_v54, %v407_v62 }
 0x1b8   : > { %v422_v3 = vmul.f32 %v411_v0, %v398_v1 }
 0x1b9   : > { %v415_v2 = vmul.f32 0.5, %v414_v63 }
 0x1ba   : > { %v436_v7 = vmul.f32 %v429_v38, %v422_v3 }
 0x1bb   : > { %v416_v4 = vsub.f32 1.5, %v415_v2 }
 0x1bc   : > { %v450_v12 = vadd.f32 %v443_v10, %v436_v7 }
 0x1bd   : > { %v417_v5 = vmul.f32 %v614_v60, %v416_v4  ;;  %v434_v11 = vpop.permute.xlu1 %433 }
 0x1be   : > { %v452_v17 = vmul.f32 %v700_v16, %v450_v12 }
 0x1bf   : > { %v421_v8 = vsel %vm420_vm7, %v614_v60, %v417_v5 }
 0x1c0   : > { %v423_v9 = vmul.f32 %v421_v8, %v399_v6 }
 0x1c2   : > { %v437_v13 = vmul.f32 %v434_v11, %v423_v9 }
 0x1c4   : > { %v451_v15 = vadd.f32 %v448_v14, %v437_v13 }
 0x1c6   : > { %v453_v18 = vmul.f32 %v700_v16, %v451_v15 }
 0x1c8   : > { %v603_v19 = vpack.i.bf16 %v453_v18, %v452_v17 }
 0x1ca   : > { %604 = vrot.lane.b32.xlu1 %v603_v19, %s628_s20 }
 0x23c   : > { %v605_v20 = vpop.permute.xlu1 %604 }
 0x23d   : > { %v607_v21 = vunpack.i.h.bf16 %v605_v20  ;;  %v606_v22 = vunpack.i.l.bf16 %v605_v20 }
 0x23f   : > { %v464_v23 = vsel %vm462_vm8, 0.0, %v607_v21  ;;  %v463_v24 = vsel %vm462_vm8, 0.0, %v606_v22 }
 0x240   : > { %v467_v25 = vsel %vm465_vm9, %v464_v23, 0.0  ;;  %v466_v26 = vsel %vm465_vm9, %v463_v24, 0.0 }
 0x241   : > { %v469_v27 = vpack.c.bf16 %v467_v25, %v467_v25  ;;  %v468_v16 = vpack.c.bf16 %v466_v26, %v466_v26 }
 0x243   : > { %472 = vst.msk [vmem:[%s291_s26 + $0x4] sm:$0xf] %vm470_vm10, %v469_v27 }
 0x244   : > { %471 = vst.msk [vmem:[%s291_s26] sm:$0xf] %vm470_vm10, %v468_v16 }
 0x245 PF: > { %s16_s21 = sadd.s32 1, %s621_s21  }
 0x246   : > { %p13_p4 = scmp.ge.s32.totalorder %s16_s21, 4  }
 0x248   :  { %15 = sbr.rel (!%p13_p4) target bundleno = 1 (0x1), region = 80 }

// kernel: _lambda_.7
= control target key start
LH: loop header
LB: loop body
LE: loop exit
PB: predicated region body
PF: predicated region fallthrough
CT: control target
= control target key end

     0   :  { %s841_s24 = smov 0   ;;  %s983_s0 = inlined_call_operand.vmem [shape: bf16[2,16,42], index: 0, kind: input, shape index: {}]   ;;  %s984_s1 = inlined_call_operand.vmem [shape: bf16[32,144], index: 1, kind: input, shape index: {}]   ;;  %s985_s2 = inlined_call_operand.vmem [shape: f32[32,1], index: 2, kind: input, shape index: {}]   ;;  %s986_s3 = inlined_call_operand.vmem [shape: bf16[2,32,42], index: 3, kind: input, shape index: {}]   ;;  %s987_s4 = inlined_call_operand.vmem [shape: f32[2,8,1], index: 4, kind: input, shape index: {}]   ;;  %s988_s5 = inlined_call_operand.vmem [shape: f32[2,8,1], index: 5, kind: input, shape index: {}]   ;;  %s989_s6 = inlined_call_operand.vmem [shape: f32[1,24], index: 6, kind: input, shape index: {}]   ;;  %s990_s7 = inlined_call_operand.vmem [shape: bf16[2,32,42], index: 7, kind: output, shape index: {}]  }
   0x1 LB: > { %s693_s25 = sadd.s32 4294967295, %s788_s24   ;;  %p697_p0 = scmp.ge.s32.totalorder %s788_s24, 1  ;;  %s788_s24 = sphi %s841_s24, %s17_s24  }
   0x2   : > { %p265_p1 = scmp.lt.s32.totalorder %s788_s24, 3 }
   0x4   : > { %p266_p2 = pnand %p697_p0, %p265_p1 }
   0x5   : > { %p310_p3 = scmp.lt.s32.totalorder (!%p266_p2), %s693_s25, 1  ;;  %s790_s11 = smov (!%p266_p2), 115  }
   0x6   : > { %269 = sbr.rel (%p266_p2) target bundleno = 437 (0x1b5), region = 48  ;;  %s791_s12 = smov (!%p266_p2), 120  }
   0x7   : > { %s792_s13 = smov (!%p266_p2), 122   ;;  %s793_s14 = smov (!%p266_p2), 116  }
   0x8   : > { %s794_s15 = smov (!%p266_p2), 121   ;;  %s795_s16 = smov (!%p266_p2), 126  }
   0x9   : > { %s796_s17 = smov (!%p266_p2), 114   ;;  %s797_s18 = smov (!%p266_p2), 127  }
   0xb   : > { %s992_s25 = smov (!%p310_p3, %s693_s25), 1  ;;  %vm465_vm0 = vcmask 252984   ;;  %v370_v25 = vld [vmem:[%s985_s2] sm:$0xff]  ;;  %v798_v26 = vmov 0   ;;  %v371_v27 = vld [vmem:[%s985_s2 + $0x8] sm:$0xff]  ;;  %v373_v28 = vld [vmem:[%s985_s2 + $0x18] sm:$0xff] }
   0xc   : > { %s852_s26 = sshll.u32 %s992_s25, 3  ;;  %s731_s30 = sshll.u32 %s992_s25, 4  ;;  %774 = vset.pattern.permute.xlu1 %v798_v26  ;;  %775 = vset.pattern.permute.xlu2 %v798_v26  ;;  %v372_v32 = vld [vmem:[%s985_s2 + $0x10] sm:$0xff]  ;;  %v734_v37 = vld [vmem:[%s984_s1 + $0x4] sm:$0xf]  ;;  %vm488_vm1 = vcmask 195584  }
   0xd   : > { %s314_s29 = scalar_lea.vmem %s983_s0, %s852_s26  ;;  %s319_s10 = scalar_lea.vmem %s986_s3, %s731_s30  ;;  %776 = vset.pattern.permute.xlu0 %v798_v26  ;;  %v714_v38 = vld [vmem:[%s984_s1 + $0x8] sm:$0xf0]  ;;  %vm412_vm2 = vcmask 130048   ;;  %v712_v47 = vld [vmem:[%s984_s1] sm:$0xf]  ;;  %vm583_vm7 = vcmask 56320  }
   0xe   : > { %v858_v0 = vld [vmem:[%s314_s29] sm:$0xff]  ;;  %v746_v4 = vld [vmem:[%s319_s10 + $0x8] sm:$0xff]   ;;  %v717_v41 = vor.u32 %v734_v37, %v714_v38  ;;  %v720_v49 = vld [vmem:[%s984_s1 + $0x10] sm:$0xf]  ;;  %vm588_vm8 = vcmask 252928   ;;  %vm597_vm9 = vcmask 338944  }
   0xf   : > { %360 = vrot.lane.b32.xlu0 %v858_v0, %s790_s11  ;;  %354 = vrot.lane.b32.xlu1 %v858_v0, %s791_s12  ;;  %v739_v1 = vld [vmem:[%s319_s10] sm:$0xff]   ;;  %v873_v5 = vunpack.c.l.bf16 %v746_v4  ;;  %v887_v12 = vunpack.c.h.bf16 %v746_v4  ;;  %s323_s10 = scalar_lea.vmem %s987_s4, %s852_s26  ;;  %v735_v48 = vld [vmem:[%s984_s1 + $0x4] sm:$0xf0]  ;;  %s799_s12 = smov 7  }
  0x10   : > { %348 = vrot.lane.b32.xlu2 %v858_v0, %s792_s13  ;;  %v869_v2 = vunpack.c.l.bf16 %v739_v1  ;;  %v871_v3 = vunpack.c.h.bf16 %v739_v1  ;;  %v529_v35 = vld [vmem:[%s323_s10] sm:$0xff]  ;;  %v737_v50 = vld [vmem:[%s984_s1 + $0x14] sm:$0xf0]  ;;  %v736_v51 = vld [vmem:[%s984_s1 + $0x14] sm:$0xf]  ;;  %v713_v53 = vor.u32 %v735_v48, %v712_v47 }
  0x11   : > { %v469_v11 = vsel %vm465_vm0, %v873_v5, 0.0  ;;  %v475_v13 = vmul.f32 %v873_v5, %v873_v5  ;;  %v471_v17 = vsel %vm465_vm0, %v887_v12, 0.0  ;;  %v476_v19 = vmul.f32 %v887_v12, %v887_v12  ;;  %v722_v52 = vld [vmem:[%s984_s1 + $0x18] sm:$0xf0]  ;;  %v777_v56 = vld [vmem:[%s989_s6] ss:$0 sm:$0xff] }
  0x12   : > { %v466_v6 = vsel %vm465_vm0, %v869_v2, 0.0  ;;  %v467_v7 = vsel %vm465_vm0, %v871_v3, 0.0  ;;  %v473_v8 = vmul.f32 %v869_v2, %v869_v2  ;;  %v474_v9 = vmul.f32 %v871_v3, %v871_v3 }
  0x13   : > { %v468_v10 = vadd.f32 %v467_v7, %v466_v6  ;;  %v480_v20 = vsel %vm465_vm0, %v475_v13, 0.0  ;;  %v482_v23 = vsel %vm465_vm0, %v476_v19, 0.0  ;;  %v721_v54 = vor.u32 %v737_v50, %v720_v49 }
  0x14   : > { %v477_v14 = vsel %vm465_vm0, %v473_v8, 0.0  ;;  %v478_v15 = vsel %vm465_vm0, %v474_v9, 0.0  ;;  %v725_v55 = vor.u32 %v736_v51, %v722_v52 }
  0x15   : > { %v470_v16 = vadd.f32 %v469_v11, %v468_v10  ;;  %v479_v18 = vadd.f32 %v478_v15, %v477_v14  ;;  %v800_v15 = vmov 64.0  }
  0x16   : > { %778 = vrcp.f32 %v800_v15 }
  0x17   : > { %357 = vrot.lane.b32.xlu0 %v858_v0, %s793_s14  ;;  %351 = vrot.lane.b32.xlu1 %v858_v0, %s794_s15  ;;  %v472_v21 = vadd.f32 %v471_v17, %v470_v16  ;;  %v481_v22 = vadd.f32 %v480_v20, %v479_v18 }
  0x18   : > { %345 = vrot.lane.b32.xlu2 %v858_v0, %s795_s16 }
  0x19   : > { %v483_v24 = vadd.f32 %v482_v23, %v481_v22 }
  0x1c   : > { %v779_v18 = vpop.eup %778 }
  0x1d   : > { %v493_v19 = vmul.f32 64.0, %v779_v18  ;;  %vm497_vm3 = vweird.f32 %v779_v18 }
  0x1f   : > { %363 = vrot.lane.b32.xlu0 %v858_v0, %s796_s17  ;;  %342 = vrot.lane.b32.xlu1 %v858_v0, %s797_s18  ;;  %s327_s17 = scalar_lea.vmem %s988_s5, %s852_s26  ;;  %v494_v20 = vsub.f32 1.0, %v493_v19 }
  0x20   : > { %485 = vrot.lane.b32.xlu2 %v472_v21, %s794_s15  ;;  %v539_v43 = vld [vmem:[%s327_s17] sm:$0xff] }
  0x21   : > { %v495_v21 = vmul.f32 %v779_v18, %v494_v20 }
  0x23   : > { %v496_v22 = vadd.f32 %v779_v18, %v495_v21 }
  0x25   : > { %v498_v23 = vsel %vm497_vm3, %v779_v18, %v496_v22 }
  0x27   : > { %501 = vrot.lane.b32.xlu0 %v483_v24, %s794_s15  ;;  %376 = vperm.xlu1 %774, %v370_v25   ;;  %s961_s15 = scalar_lea.vmem %s990_s7, %s731_s30 }
  0x28   : > { %381 = vperm.xlu2 %775, %v371_v27  }
  0x2f   : > { %391 = vperm.xlu1 %774, %v373_v28   ;;  %386 = vperm.xlu0 %776, %v372_v32  }
  0x37   : > { %532 = vperm.xlu0 %776, %v529_v35  }
  0x3f   : > { %542 = vperm.xlu0 %776, %v539_v43  }
  0x6a   : > { %v349_v29 = vpop.permute.xlu2 %348 }
  0x72   : > { %v346_v34 = vpop.permute.xlu2 %345 }
  0x7a   : > { %v486_v40 = vpop.permute.xlu2 %485 }
  0x7b   : > { %v489_v42 = vsel %vm488_vm1, %v486_v40, 0.0 }
  0x7c   : > { %490 = vadd.xlane.f32.xlu2 %v489_v42 }
  0x81   : > { %v361_v30 = vpop.permute.xlu0 %360  ;;  %v355_v31 = vpop.permute.xlu1 %354 }
  0x82   : > { %419 = vmatpush.bf16.msra.mxu0 %v361_v30  ;;  %747 = vmatpush.bf16.msra.mxu2 %v361_v30  ;;  %v382_v1 = vpop.permute.xlu2 %381 }
  0x89   : > { %v358_v33 = vpop.permute.xlu0 %357  ;;  %v352_v36 = vpop.permute.xlu1 %351 }
  0x8a   : > { %420 = vmatpush.bf16.msra.mxu0 %v358_v33  ;;  %748 = vmatpush.bf16.msra.mxu2 %v358_v33 }
  0x8e   : > { %421 = vmatpush.bf16.msra.mxu0 %v355_v31  ;;  %749 = vmatpush.bf16.msra.mxu2 %v355_v31 }
  0x91   : > { %v364_v39 = vpop.permute.xlu0 %363  ;;  %v343_v46 = vpop.permute.xlu1 %342 }
  0x92   : > { %422 = vmatpush.bf16.msra.mxu0 %v352_v36  ;;  %750 = vmatpush.bf16.msra.mxu2 %v352_v36 }
  0x93   : > { %445 = vmatpush.bf16.msra.mxu1 %v364_v39 }
  0x96   : > { %423 = vmatpush.bf16.msra.mxu0 %v349_v29  ;;  %751 = vmatpush.bf16.msra.mxu2 %v349_v29 }
  0x97   : > { %726 = vmatmul.msk.bf16.vlgmr.msra.gmra.mxu1 %vm412_vm2, %v717_v41 }
  0x99   : > { %v502_v44 = vpop.permute.xlu0 %501  ;;  %v377_v59 = vpop.permute.xlu1 %376 }
  0x9a   : > { %424 = vmatpush.bf16.msra.mxu0 %v346_v34  ;;  %752 = vmatpush.bf16.msra.mxu2 %v346_v34  ;;  %v504_v45 = vsel %vm488_vm1, %v502_v44, 0.0 }
  0x9b   : > { %505 = vadd.xlane.f32.xlu1 %v504_v45 }
  0x9e   : > { %425 = vmatpush.bf16.msra.mxu0 %v343_v46  ;;  %753 = vmatpush.bf16.msra.mxu2 %v343_v46 }
  0xa1   : > { %v387_v63 = vpop.permute.xlu0 %386  ;;  %v392_v11 = vpop.permute.xlu1 %391 }
  0xa2   : > { %426 = vmatpush.bf16.msra.mxu0 %v858_v0  ;;  %754 = vmatpush.bf16.msra.mxu2 %v858_v0 }
  0xa5   : > { %427 = vmatmul.bf16.vlgmr.msra.gmra.mxu0 %v713_v53  ;;  %432 = vmatmul.bf16.vlgmr.msra.gmra.mxu2 %v721_v54 }
  0xa7   : > { %727 = vmatmul.msk.bf16.gmra.mxu1 %vm412_vm2, %v725_v55 }
  0xa9   : > { %v533_v37 = vpop.permute.xlu0 %532 }
  0xb1   : > { %v543_v42 = vpop.permute.xlu0 %542 }
  0xb4   : > { %576 = vrot.lane.b32.xlu1 %v777_v56, %s799_s12 }
  0xef   : > { %v491_v24 = vpop.xlane.xlu2 %490 }
  0xf0   : > { %v499_v25 = vmul.f32 %v498_v23, %v491_v24 }
  0xf2   : > { %v508_v27 = vmul.f32 %v499_v25, %v499_v25  ;;  %v512_v38 = vsub.f32 %v873_v5, %v499_v25  ;;  %v510_v49 = vsub.f32 %v869_v2, %v499_v25  ;;  %v511_v54 = vsub.f32 %v871_v3, %v499_v25 }
 0x10e   : > { %v506_v26 = vpop.xlane.xlu1 %505 }
 0x10f   : > { %v507_v28 = vmul.f32 %v506_v26, %v498_v23 }
 0x111   : > { %v509_v29 = vsub.f32 %v507_v28, %v508_v27 }
 0x113   : > { %v514_v30 = vadd.f32 1e-05, %v509_v29 }
 0x114   : > { %v447_v57 = vpop.f32.mrf.mxu1 }
 0x115   : > { %780 = vrsqrt.f32 %v514_v30  ;;  %vm521_vm4 = vweird.f32 %v514_v30 }
 0x11b   : > { %v781_v31 = vpop.eup %780 }
 0x11c   : > { %v449_v58 = vpop.f32.mrf.mxu1  ;;  %v516_v32 = vmul.f32 %v781_v31, %v514_v30  ;;  %vm522_vm5 = vweird.f32 %v781_v31 }
 0x11d   : > { %vm523_vm6 = vmor %vm521_vm4, %vm522_vm5 }
 0x11e   : > { %v517_v33 = vmul.f32 %v781_v31, %v516_v32 }
 0x120   : > { %v518_v34 = vmul.f32 0.5, %v517_v33 }
 0x122   : > { %v428_v60 = vpop.f32.mrf.mxu0  ;;  %v519_v35 = vsub.f32 1.5, %v518_v34 }
 0x123   : > { %v429_v61 = vadd.f32 %v428_v60, %v377_v59  ;;  %v513_v60 = vsub.f32 %v887_v12, %v499_v25 }
 0x124   : > { %v452_v6 = vpop.f32.mrf.mxu1  ;;  %v520_v36 = vmul.f32 %v781_v31, %v519_v35 }
 0x125   : > { %v448_v62 = vadd.f32 %v447_v57, %v429_v61 }
 0x126   : > { %v524_v39 = vsel %vm523_vm6, %v781_v31, %v520_v36  ;;  %v577_v46 = vpop.permute.xlu1 %576 }
 0x127   : > { %553 = vrot.lane.b32.xlu0 %v448_v62, %s799_s12  ;;  %v527_v40 = vmul.f32 %v524_v39, %v512_v38  ;;  %v525_v52 = vmul.f32 %v524_v39, %v510_v49  ;;  %v526_v55 = vmul.f32 %v524_v39, %v511_v54 }
 0x128   : > { %v433_v0 = vpop.f32.mrf.mxu2 }
 0x129   : > { %v434_v4 = vadd.f32 %v433_v0, %v387_v63  ;;  %v537_v41 = vmul.f32 %v533_v37, %v527_v40  ;;  %v535_v53 = vmul.f32 %v533_v37, %v525_v52  ;;  %v536_v59 = vmul.f32 %v533_v37, %v526_v55 }
 0x12a   : > { %v430_v7 = vpop.f32.mrf.mxu0  ;;  %v528_v0 = vmul.f32 %v524_v39, %v513_v60 }
 0x12b   : > { %v453_v8 = vadd.f32 %v452_v6, %v434_v4  ;;  %v431_v9 = vadd.f32 %v430_v7, %v382_v1  ;;  %v547_v43 = vadd.f32 %v543_v42, %v537_v41  ;;  %v545_v2 = vadd.f32 %v543_v42, %v535_v53 }
 0x12c   : > { %v454_v16 = vpop.f32.mrf.mxu1  ;;  %v546_v63 = vadd.f32 %v543_v42, %v536_v59 }
 0x12d   : > { %v450_v10 = vadd.f32 %v449_v58, %v431_v9  ;;  %557 = vrot.lane.b32.xlu2 %v453_v8, %s799_s12  ;;  %v538_v8 = vmul.f32 %v533_v37, %v528_v0 }
 0x12f   : > { %555 = vrot.lane.b32.xlu0 %v450_v10, %s799_s12  ;;  %v548_v12 = vadd.f32 %v543_v42, %v538_v8 }
 0x130   : > { %v435_v13 = vpop.f32.mrf.mxu2 }
 0x131   : > { %v436_v14 = vadd.f32 %v435_v13, %v392_v11 }
 0x133   : > { %v455_v17 = vadd.f32 %v454_v16, %v436_v14 }
 0x137   : > { %559 = vrot.lane.b32.xlu0 %v455_v17, %s799_s12 }
 0x187   : > { %v558_v44 = vpop.permute.xlu2 %557 }
 0x188   : > { %v567_v45 = vadd.f32 %v558_v44, %v547_v43 }
 0x18a   : > { %v571_v47 = vmax.f32 %v567_v45, 0.0 }
 0x18c   : > { %v581_v48 = vmul.f32 %v577_v46, %v571_v47 }
 0x18e   : > { %v586_v50 = vsel %vm583_vm7, 0.0, %v581_v48 }
 0x18f   : > { %v591_v5 = vsel %vm588_vm8, %v586_v50, 0.0 }
 0x190   : > { %v595_v51 = vpack.c.bf16 %v591_v5, %v591_v5 }
 0x192   : > { %600 = vst.msk [vmem:[%s961_s15 + $0x8] sm:$0xf] %vm597_vm9, %v595_v51 }
 0x199   : > { %v554_v56 = vpop.permute.xlu0 %553 }
 0x19a   : > { %v565_v57 = vadd.f32 %v554_v56, %v545_v2 }
 0x19c   : > { %v569_v58 = vmax.f32 %v565_v57, 0.0 }
 0x19e   : > { %v579_v61 = vmul.f32 %v577_v46, %v569_v58 }
 0x1a0   : > { %v584_v62 = vsel %vm583_vm7, 0.0, %v579_v61 }
 0x1a1   : > { %v589_v1 = vsel %vm588_vm8, %v584_v62, 0.0  ;;  %v556_v4 = vpop.permute.xlu0 %555 }
 0x1a2   : > { %v593_v6 = vpack.c.bf16 %v589_v1, %v589_v1  ;;  %v566_v3 = vadd.f32 %v556_v4, %v546_v63 }
 0x1a4   : > { %598 = vst.msk [vmem:[%s961_s15] sm:$0xf] %vm597_vm9, %v593_v6  ;;  %v570_v7 = vmax.f32 %v566_v3, 0.0 }
 0x1a6   : > { %v580_v9 = vmul.f32 %v577_v46, %v570_v7 }
 0x1a8   : > { %v585_v10 = vsel %vm583_vm7, 0.0, %v580_v9 }
 0x1a9   : > { %v590_v11 = vsel %vm588_vm8, %v585_v10, 0.0  ;;  %v560_v13 = vpop.permute.xlu0 %559 }
 0x1aa   : > { %v594_v14 = vpack.c.bf16 %v590_v11, %v590_v11  ;;  %v568_v15 = vadd.f32 %v560_v13, %v548_v12 }
 0x1ac   : > { %599 = vst.msk [vmem:[%s961_s15 + $0x4] sm:$0xf] %vm597_vm9, %v594_v14  ;;  %v572_v16 = vmax.f32 %v568_v15, 0.0 }
 0x1ae   : > { %v582_v17 = vmul.f32 %v577_v46, %v572_v16 }
 0x1b0   : > { %v587_v18 = vsel %vm583_vm7, 0.0, %v582_v17 }
 0x1b1   : > { %v592_v19 = vsel %vm588_vm8, %v587_v18, 0.0 }
 0x1b2   : > { %v596_v20 = vpack.c.bf16 %v592_v19, %v592_v19 }
 0x1b4   : > { %601 = vst.msk [vmem:[%s961_s15 + $0xc] sm:$0xf] %vm597_vm9, %v596_v20 }
 0x1b5 PF: > { %s17_s24 = sadd.s32 1, %s788_s24  }
 0x1b6   : > { %p14_p4 = scmp.ge.s32.totalorder %s17_s24, 4  }
 0x1b8   :  { %16 = sbr.rel (!%p14_p4) target bundleno = 1 (0x1), region = 87 }

// kernel: tile.17
= control target key start
LH: loop header
LB: loop body
LE: loop exit
PB: predicated region body
PF: predicated region fallthrough
CT: control target
= control target key end

     0   :  { %s26_s0 = inlined_call_operand.<no memory space> [shape: f32[], index: 0, kind: input, shape index: {}]   ;;  %s27_s1 = inlined_call_operand.vmem [shape: f32[16,1], index: 1, kind: output, shape index: {}]  }
   0x1   :  { %v2_v0 = vstv %s26_s0 }
   0x2   :  { %3 = vst [vmem:[%s27_s1] sm:$0xff] %v2_v0 }
   0x3   :  { %6 = vst [vmem:[%s27_s1 + $0x8] sm:$0xff] %v2_v0 }

// kernel: _lambda_.8
= control target key start
LH: loop header
LB: loop body
LE: loop exit
PB: predicated region body
PF: predicated region fallthrough
CT: control target
= control target key end

     0   :  { %s467_s12 = smov 0   ;;  %s515_s0 = inlined_call_operand.vmem [shape: bf16[2,32,42], index: 0, kind: input, shape index: {}]   ;;  %s516_s1 = inlined_call_operand.vmem [shape: bf16[16,288], index: 1, kind: input, shape index: {}]   ;;  %s517_s2 = inlined_call_operand.vmem [shape: f32[16,1], index: 2, kind: input, shape index: {}]   ;;  %s518_s3 = inlined_call_operand.vmem [shape: f32[2,16,24], index: 3, kind: output, shape index: {}]  }
   0x1 LB: > { %s371_s13 = sadd.s32 4294967295, %s436_s12   ;;  %p375_p0 = scmp.ge.s32.totalorder %s436_s12, 1  ;;  %s436_s12 = sphi %s467_s12, %s13_s12  }
   0x2   : > { %p137_p1 = scmp.lt.s32.totalorder %s436_s12, 3 }
   0x4   : > { %p138_p2 = pnand %p375_p0, %p137_p1 }
   0x5   : > { %p161_p3 = scmp.lt.s32.totalorder (!%p138_p2), %s371_s13, 1  ;;  %s438_s18 = smov (!%p138_p2), 122  }
   0x6   : > { %141 = sbr.rel (%p138_p2) target bundleno = 312 (0x138), region = 32  ;;  %s439_s19 = smov (!%p138_p2), 126  }
   0x7   : > { %s440_s20 = smov (!%p138_p2), 115   ;;  %s441_s21 = smov (!%p138_p2), 116  }
   0x8   : > { %s442_s22 = smov (!%p138_p2), 127   ;;  %s443_s23 = smov (!%p138_p2), 120  }
   0x9   : > { %s444_s24 = smov (!%p138_p2), 114   ;;  %s445_s25 = smov (!%p138_p2), 121  }
   0xb   : > { %s520_s13 = smov (!%p161_p3, %s371_s13), 1  ;;  %v240_v8 = vld [vmem:[%s517_s2] sm:$0xff]  ;;  %v241_v9 = vld [vmem:[%s517_s2 + $0x8] sm:$0xff]  ;;  %v446_v11 = vmov 0   ;;  %v409_v23 = vld [vmem:[%s516_s1 + $0x10] sm:$0xf0] }
   0xc   : > { %s403_s14 = sshll.u32 %s520_s13, 4  ;;  %427 = vset.pattern.permute.xlu1 %v446_v11  ;;  %428 = vset.pattern.permute.xlu2 %v446_v11  ;;  %v390_v17 = vld [vmem:[%s516_s1] sm:$0xf]  ;;  %v408_v18 = vld [vmem:[%s516_s1 + $0x8] sm:$0xf0]  ;;  %vm267_vm0 = vcmask 261120  }
   0xd   : > { %s165_s17 = scalar_lea.vmem %s515_s0, %s403_s14  ;;  %429 = vset.pattern.permute.xlu0 %v446_v11  ;;  %v391_v20 = vor.u32 %v408_v18, %v390_v17  ;;  %v398_v22 = vld [vmem:[%s516_s1 + $0x8] sm:$0xf]  ;;  %v407_v26 = vld [vmem:[%s516_s1 + $0x4] sm:$0xf]  ;;  %v392_v27 = vld [vmem:[%s516_s1 + $0xc] sm:$0xf0] }
   0xe   : > { %v406_v0 = vld [vmem:[%s165_s17 + $0x8] sm:$0xff]  ;;  %v405_v1 = vld [vmem:[%s165_s17] sm:$0xff]  ;;  %v399_v25 = vor.u32 %v409_v23, %v398_v22  ;;  %v395_v29 = vor.u32 %v407_v26, %v392_v27  ;;  %vm313_vm1 = vcmask 195584  }
   0xf   : > { %202 = vrot.lane.b32.xlu0 %v406_v0, %s438_s18  ;;  %200 = vrot.lane.b32.xlu1 %v405_v1, %s438_s18 }
  0x10   : > { %196 = vrot.lane.b32.xlu2 %v406_v0, %s439_s19 }
  0x17   : > { %226 = vrot.lane.b32.xlu0 %v406_v0, %s440_s20  ;;  %224 = vrot.lane.b32.xlu1 %v405_v1, %s440_s20  ;;  %s170_s20 = scalar_lea.vmem %s518_s3, %s403_s14 }
  0x18   : > { %220 = vrot.lane.b32.xlu2 %v406_v0, %s441_s21 }
  0x1f   : > { %194 = vrot.lane.b32.xlu0 %v405_v1, %s439_s19  ;;  %218 = vrot.lane.b32.xlu1 %v405_v1, %s441_s21 }
  0x20   : > { %190 = vrot.lane.b32.xlu2 %v406_v0, %s442_s22 }
  0x27   : > { %214 = vrot.lane.b32.xlu0 %v406_v0, %s443_s23  ;;  %188 = vrot.lane.b32.xlu1 %v405_v1, %s442_s22 }
  0x28   : > { %212 = vrot.lane.b32.xlu2 %v405_v1, %s443_s23 }
  0x2f   : > { %232 = vrot.lane.b32.xlu0 %v406_v0, %s444_s24  ;;  %208 = vrot.lane.b32.xlu1 %v406_v0, %s445_s25 }
  0x30   : > { %230 = vrot.lane.b32.xlu2 %v405_v1, %s444_s24 }
  0x37   : > { %206 = vrot.lane.b32.xlu0 %v405_v1, %s445_s25  ;;  %244 = vperm.xlu1 %427, %v240_v8  }
  0x38   : > { %249 = vperm.xlu2 %428, %v241_v9  }
  0x6a   : > { %v197_v2 = vpop.permute.xlu2 %196 }
  0x72   : > { %v221_v5 = vpop.permute.xlu2 %220 }
  0x7a   : > { %v191_v10 = vpop.permute.xlu2 %190 }
  0x81   : > { %v203_v3 = vpop.permute.xlu0 %202  ;;  %v201_v4 = vpop.permute.xlu1 %200 }
  0x82   : > { %271 = vmatpush.bf16.msra.mxu0 %v203_v3  ;;  %v213_v14 = vpop.permute.xlu2 %212 }
  0x86   : > { %272 = vmatpush.bf16.msra.mxu0 %v201_v4 }
  0x89   : > { %v227_v6 = vpop.permute.xlu0 %226  ;;  %v225_v7 = vpop.permute.xlu1 %224 }
  0x8a   : > { %273 = vmatpush.bf16.msra.mxu0 %v197_v2  ;;  %285 = vmatpush.bf16.msra.mxu1 %v227_v6  ;;  %v231_v24 = vpop.permute.xlu2 %230 }
  0x8e   : > { %286 = vmatpush.bf16.msra.mxu1 %v225_v7 }
  0x91   : > { %v195_v12 = vpop.permute.xlu0 %194  ;;  %v219_v13 = vpop.permute.xlu1 %218 }
  0x92   : > { %274 = vmatpush.bf16.msra.mxu0 %v195_v12  ;;  %287 = vmatpush.bf16.msra.mxu1 %v221_v5  ;;  %v250_v37 = vpop.permute.xlu2 %249 }
  0x96   : > { %275 = vmatpush.bf16.msra.mxu0 %v191_v10  ;;  %288 = vmatpush.bf16.msra.mxu1 %v219_v13 }
  0x99   : > { %v215_v15 = vpop.permute.xlu0 %214  ;;  %v189_v16 = vpop.permute.xlu1 %188 }
  0x9a   : > { %276 = vmatpush.bf16.msra.mxu0 %v189_v16  ;;  %289 = vmatpush.bf16.msra.mxu1 %v215_v15 }
  0x9e   : > { %277 = vmatpush.bf16.msra.mxu0 %v406_v0  ;;  %290 = vmatpush.bf16.msra.mxu1 %v213_v14 }
  0xa1   : > { %v233_v19 = vpop.permute.xlu0 %232  ;;  %v209_v21 = vpop.permute.xlu1 %208 }
  0xa2   : > { %278 = vmatpush.bf16.msra.mxu0 %v405_v1  ;;  %305 = vmatpush.bf16.msra.mxu2 %v233_v19 }
  0xa3   : > { %291 = vmatpush.bf16.msra.mxu1 %v209_v21 }
  0xa5   : > { %279 = vmatmul.bf16.vlgmr.msra.gmra.mxu0 %v391_v20 }
  0xa6   : > { %306 = vmatpush.bf16.msra.mxu2 %v231_v24 }
  0xa9   : > { %400 = vmatmul.msk.bf16.vlgmr.msra.gmra.mxu2 %vm267_vm0, %v399_v25  ;;  %v207_v28 = vpop.permute.xlu0 %206  ;;  %v245_v31 = vpop.permute.xlu1 %244 }
  0xaa   : > { %292 = vmatpush.bf16.msra.mxu1 %v207_v28 }
  0xad   : > { %293 = vmatmul.bf16.vlgmr.msra.gmra.mxu1 %v395_v29 }
 0x122   : > { %v280_v30 = vpop.f32.mrf.mxu0 }
 0x123   : > { %v281_v32 = vadd.f32 %v280_v30, %v245_v31 }
 0x12a   : > { %v294_v33 = vpop.f32.mrf.mxu1  ;;  %v282_v38 = vpop.f32.mrf.mxu0 }
 0x12b   : > { %v295_v34 = vadd.f32 %v294_v33, %v281_v32  ;;  %v283_v39 = vadd.f32 %v282_v38, %v250_v37 }
 0x12c   : > { %v308_v35 = vpop.f32.mrf.mxu2 }
 0x12d   : > { %v309_v36 = vadd.f32 %v308_v35, %v295_v34 }
 0x12f   : > { %314 = vst.msk [vmem:[%s170_s20] sm:$0xff] %vm313_vm1, %v309_v36 }
 0x132   : > { %v296_v40 = vpop.f32.mrf.mxu1 }
 0x133   : > { %v297_v41 = vadd.f32 %v296_v40, %v283_v39 }
 0x134   : > { %v310_v42 = vpop.f32.mrf.mxu2 }
 0x135   : > { %v311_v43 = vadd.f32 %v310_v42, %v297_v41 }
 0x137   : > { %315 = vst.msk [vmem:[%s170_s20 + $0x8] sm:$0xff] %vm313_vm1, %v311_v43 }
 0x138 PF: > { %s13_s12 = sadd.s32 1, %s436_s12  }
 0x139   : > { %p10_p4 = scmp.ge.s32.totalorder %s13_s12, 4  }
 0x13b   :  { %12 = sbr.rel (!%p10_p4) target bundleno = 1 (0x1), region = 62 }

// kernel: _lambda_.9
= control target key start
LH: loop header
LB: loop body
LE: loop exit
PB: predicated region body
PF: predicated region fallthrough
CT: control target
= control target key end

     0   :  { %s330_s9 = smov 0   ;;  %s364_s0 = inlined_call_operand.vmem [shape: f32[2,1,256], index: 0, kind: input, shape index: {}]   ;;  %s365_s1 = inlined_call_operand.vmem [shape: f32[2,1,256], index: 1, kind: input, shape index: {}]   ;;  %s366_s2 = inlined_call_operand.vmem [shape: f32[2,1,8], index: 2, kind: output, shape index: {}]  }
   0x1 LB: > { %s287_s10 = sadd.s32 4294967295, %s312_s9   ;;  %p291_p0 = scmp.ge.s32.totalorder %s312_s9, 1  ;;  %s312_s9 = sphi %s330_s9, %s12_s9  }
   0x2   : > { %p120_p1 = scmp.lt.s32.totalorder %s312_s9, 3 }
   0x4   : > { %p121_p2 = pnand %p291_p0, %p120_p1 }
   0x5   : > { %p143_p3 = scmp.lt.s32.totalorder (!%p121_p2), %s287_s10, 1 }
   0x6   : > { %124 = sbr.rel (%p121_p2) target bundleno = 157 (0x9d), region = 28 }
   0xb   : > { %s368_s10 = smov (!%p143_p3, %s287_s10), 1  ;;  %v314_v2 = vmov 0.0   ;;  %vm168_vm3 = vcmask 1040384   ;;  %vm216_vm4 = vcmask 7168   ;;  %vm218_vm5 = vcmask 15360  }
   0xc   : > { %s292_s11 = sshll.u32 %s368_s10, 1  ;;  %vm220_vm6 = vcmask 23552   ;;  %vm222_vm7 = vcmask 31744   ;;  %vm224_vm8 = vcmask 39936   ;;  %s153_s20 = scalar_lea.vmem %s366_s2, %s368_s10  ;;  %vm226_vm9 = vcmask 57344  }
   0xd   : > { %s146_s14 = scalar_lea.vmem %s364_s0, %s292_s11  ;;  %s150_s17 = scalar_lea.vmem %s365_s1, %s292_s11 }
   0xe   : > { %v155_v0 = vld [vmem:[%s150_s17] sm:$0x3] }
   0xf   : > { %v154_v1 = vld [vmem:[%s146_s14] sm:$0x3]  ;;  %vm156_vm0 = vcmp.gt.f32.partialorder %v155_v0, -1e-08  ;;  %vm157_vm1 = vcmp.lt.f32.partialorder %v155_v0, 10.1 }
  0x10   : > { %vm158_vm2 = vmand %vm156_vm0, %vm157_vm1 }
  0x11   : > { %v294_v3 = vsel %vm158_vm2, 1.0, %v314_v2 }
  0x12   : > { %v161_v4 = vmul.f32 %v294_v3, %v154_v1  ;;  %v185_v5 = vperm.slane %v294_v3, 0  ;;  %v186_v6 = vperm.slane %v294_v3, 1  ;;  %v205_v7 = vmul.f32 %v294_v3, %v155_v0 }
  0x14   : > { %v162_v8 = vmul.f32 %v161_v4, %v154_v1  ;;  %v189_v9 = vsel %vm168_vm3, %v185_v5, 0.0  ;;  %v190_v10 = vsel %vm168_vm3, %v186_v6, 0.0  ;;  %v194_v12 = vmul.f32 %v161_v4, %v155_v0 }
  0x15   : > { %v191_v11 = vadd.f32 %v190_v10, %v189_v9  ;;  %v207_v13 = vperm.slane %v205_v7, 0  ;;  %v208_v16 = vperm.slane %v205_v7, 1  ;;  %v175_v17 = vperm.slane %v161_v4, 0 }
  0x16   : > { %v164_v14 = vperm.slane %v162_v8, 0  ;;  %v165_v15 = vperm.slane %v162_v8, 1  ;;  %v196_v18 = vperm.slane %v194_v12, 0  ;;  %v197_v19 = vperm.slane %v194_v12, 1 }
  0x17   : > { %192 = vadd.xlane.f32.xlu1 %v191_v11  ;;  %v211_v20 = vsel %vm168_vm3, %v207_v13, 0.0  ;;  %v176_v23 = vperm.slane %v161_v4, 1  ;;  %v212_v24 = vsel %vm168_vm3, %v208_v16, 0.0  ;;  %v179_v30 = vsel %vm168_vm3, %v175_v17, 0.0 }
  0x18   : > { %v169_v21 = vsel %vm168_vm3, %v164_v14, 0.0  ;;  %v170_v22 = vsel %vm168_vm3, %v165_v15, 0.0  ;;  %v200_v26 = vsel %vm168_vm3, %v196_v18, 0.0  ;;  %v201_v27 = vsel %vm168_vm3, %v197_v19, 0.0 }
  0x19   : > { %v171_v25 = vadd.f32 %v170_v22, %v169_v21  ;;  %v213_v28 = vadd.f32 %v212_v24, %v211_v20  ;;  %v202_v29 = vadd.f32 %v201_v27, %v200_v26  ;;  %v180_v31 = vsel %vm168_vm3, %v176_v23, 0.0 }
  0x1a   : > { %v181_v32 = vadd.f32 %v180_v31, %v179_v30 }
  0x1b   : > { %172 = vadd.xlane.f32.xlu0 %v171_v25  ;;  %214 = vadd.xlane.f32.xlu2 %v213_v28 }
  0x1f   : > { %203 = vadd.xlane.f32.xlu1 %v202_v29 }
  0x23   : > { %182 = vadd.xlane.f32.xlu0 %v181_v32 }
  0x8a   : > { %v193_v33 = vpop.xlane.xlu1 %192 }
  0x8e   : > { %v173_v34 = vpop.xlane.xlu0 %172  ;;  %v215_v38 = vpop.xlane.xlu2 %214 }
  0x92   : > { %v204_v36 = vpop.xlane.xlu1 %203 }
  0x96   : > { %v183_v35 = vpop.xlane.xlu0 %182 }
  0x97   : > { %v217_v37 = vsel %vm216_vm4, %v173_v34, %v183_v35 }
  0x98   : > { %v219_v39 = vsel %vm218_vm5, %v217_v37, %v193_v33 }
  0x99   : > { %v221_v40 = vsel %vm220_vm6, %v219_v39, %v204_v36 }
  0x9a   : > { %v223_v41 = vsel %vm222_vm7, %v221_v40, %v215_v38 }
  0x9b   : > { %v225_v42 = vsel %vm224_vm8, %v223_v41, 0.0 }
  0x9c   : > { %227 = vst.msk [vmem:[%s153_s20] sm:$0x1] %vm226_vm9, %v225_v42 }
  0x9d PF: > { %s12_s9 = sadd.s32 1, %s312_s9  }
  0x9e   : > { %p9_p4 = scmp.ge.s32.totalorder %s12_s9, 4  }
  0xa0   :  { %11 = sbr.rel (!%p9_p4) target bundleno = 1 (0x1), region = 61 }

</bundles_post_ra>
